<compile_context>
chip_gen: v5e
topology: v5e:2x2
jax: 0.10.0
libtpu: 0.0.40
codegen_flags: <defaults>
</compile_context>

<pallas_src>
import math
import numpy as np

import jax
import jax.numpy as jnp
from jax import lax
from jax.experimental import pallas as pl
from jax.experimental.pallas import tpu as pltpu


# ----------------------------------------------------------------------------
# Pallas kernel: one selected (batch, expert) pair -> one (1, S, D) output.
# ----------------------------------------------------------------------------
def make_expert_attention_kernel(S, D, H):
    dk = D // H
    scale = 1.0 / math.sqrt(dk)

    def split_heads(x):            # (S, D) -> (H, S, dk); single relayout
        return jnp.transpose(x.reshape(S, H, dk), (1, 0, 2))

    def kernel(sel_e_ref, sel_b_ref,      # (N,) int32 scalar-prefetch (SMEM)
               q_ref, k_ref, v_ref,       # (1, S, D)     bf16
               bias_ref,                  # (1, S, S)     bf16 additive mask bias
               wqkv_ref,                  # (1, 3, D, D)  bf16  (Wq|Wk|Wv)
               wo_ref,                    # (1, D, D)     bf16
               bqkv_ref,                  # (1, 3, 1, D)  f32   (bq|bk|bv)
               bo_ref,                    # (1, 1, D)     f32
               out_ref):                  # (1, S, D)     f32 per-selection output
        del sel_e_ref, sel_b_ref          # consumed by the BlockSpec index_maps

        q = q_ref[0]; k = k_ref[0]; v = v_ref[0]            # (S, D) bf16
        bias = bias_ref[0].astype(jnp.float32)              # (S, S) f32

        wq = wqkv_ref[0, 0]; wk = wqkv_ref[0, 1]; wv = wqkv_ref[0, 2]   # (D, D) bf16
        bq = bqkv_ref[0, 0]; bk = bqkv_ref[0, 1]; bv = bqkv_ref[0, 2]   # (1, D) f32
        wo = wo_ref[0]                                       # (D, D) bf16
        bo = bo_ref[0]                                       # (1, D) f32

        # Full-width projections: (S, D) @ (D, D) -> (S, D), f32 accumulation.
        qp = jnp.dot(q, wq, preferred_element_type=jnp.float32) + bq
        kp = jnp.dot(k, wk, preferred_element_type=jnp.float32) + bk
        vp = jnp.dot(v, wv, preferred_element_type=jnp.float32) + bv

        # Split heads once; fold 1/sqrt(dk) into q; bf16 only as MXU operand.
        qh = split_heads(qp * scale).astype(jnp.bfloat16)    # (H, S, dk)
        kh = split_heads(kp).astype(jnp.bfloat16)
        vh = split_heads(vp).astype(jnp.bfloat16)

        # Scores for all heads at once: (H, S, dk) x (H, S, dk) -> (H, S, S).
        scores = lax.dot_general(qh, kh, (((2,), (2,)), ((0,), (0,))),
                                 preferred_element_type=jnp.float32)
        scores = scores + bias[None]

        # Softmax over keys (f32); reciprocal on the EUP slot.
        smax = jnp.max(scores, axis=-1, keepdims=True)
        ex = jnp.exp(scores - smax)
        denom = jnp.sum(ex, axis=-1, keepdims=True)
        attn = ex * pl.reciprocal(denom, approx=True)
        # TODO(synk): attention dropout omitted (eval-mode / deterministic semantics).
        # TODO(synk): for very long S, tile KV blocks (flash-style online softmax)
        # so the (H, S, S) scores never exceed v7x's 64 MiB VMEM.

        # Context: (H, S, S) x (H, S, dk) -> (H, S, dk), f32 acc.
        ctx = lax.dot_general(attn.astype(jnp.bfloat16), vh,
                              (((2,), (1,)), ((0,), (0,))),
                              preferred_element_type=jnp.float32)

        # Merge heads once and run the output projection at full contraction
        # depth D: concat(heads) @ Wo on the MXU (no per-head VPU sum).
        ctx2 = jnp.transpose(ctx, (1, 0, 2)).reshape(S, D).astype(jnp.bfloat16)
        o = jnp.dot(ctx2, wo, preferred_element_type=jnp.float32) + bo   # (S, D)

        out_ref[...] = o[None]

    return kernel


def _vmem_limit_bytes():
    default_cap = 64 * 1024 * 1024
    try:
        cap = int(getattr(pltpu.get_tpu_info(), "vmem_capacity_bytes", default_cap))
    except Exception:
        cap = default_cap
    # ~100 MiB scoped on 128-MiB parts (v5e/v6e), ~48 MiB on 64-MiB parts (v7x).
    return int(max(32 * 1024 * 1024,
                   min(cap - 16 * 1024 * 1024, 100 * 1024 * 1024)))


def moe_attention_pallas(expert_idx, expert_gates, q, k, v, mask, params):
    """expert_idx / expert_gates: (B, K) top-k expert ids / gate weights."""
    B, S, D = q.shape
    H = params["heads"]
    K = expert_idx.shape[1]
    E = params["wq"].shape[0]
    N = B * K
    zero_fill_eps = float(np.finfo(float).eps)
    bf16 = jnp.bfloat16

    # ---- expert grouping (megablocks-style): sort selections by expert id ----
    flat_expert = expert_idx.reshape(-1).astype(jnp.int32)          # (N,)
    flat_batch = jnp.repeat(jnp.arange(B, dtype=jnp.int32), K)      # (N,)
    flat_gates = expert_gates.reshape(-1).astype(jnp.float32)       # (N,)
    order = jnp.argsort(flat_expert)
    sel_expert = flat_expert[order]
    sel_batch = flat_batch[order]
    sel_gates = flat_gates[order]

    # ---- mask -> additive bias (bf16); supports (S,S), (1,S,S) or (B,S,S) ----
    if mask.ndim == 2:
        mask = mask[None]
    mask_bias = jnp.where(mask == 0, -1e9, 0.0).astype(bf16)
    if mask_bias.shape[0] == 1:
        bias_map = lambda n, e, b: (0, 0, 0)
    else:
        bias_map = lambda n, e, b: (b[n], 0, 0)

    # ---- weight prep: original (D, D) layouts, Q/K/V stacked; bf16 MXU operands ----
    wqkv = jnp.stack([params["wq"], params["wk"], params["wv"]],
                     axis=1).astype(bf16)                            # (E, 3, D, D)
    bqkv = jnp.stack([params["bq"], params["bk"], params["bv"]],
                     axis=1).astype(jnp.float32)                     # (E, 3, 1, D)
    wo = params["wo"].astype(bf16)                                   # (E, D, D)
    bo = params["bo"].astype(jnp.float32)                            # (E, 1, D)

    q_bf = q.astype(bf16)
    k_bf = k.astype(bf16)
    v_bf = v.astype(bf16)

    kernel = make_expert_attention_kernel(S, D, H)

    qkv_spec = lambda: pl.BlockSpec((1, S, D), lambda n, e, b: (b[n], 0, 0))

    grid_spec = pltpu.PrefetchScalarGridSpec(
        num_scalar_prefetch=2,           # sorted expert ids + batch ids -> SMEM
        grid=(N,),                       # only the selected (batch, expert) pairs run
        in_specs=[
            qkv_spec(), qkv_spec(), qkv_spec(),                           # q, k, v
            pl.BlockSpec((1, S, S), bias_map),                            # mask bias
            pl.BlockSpec((1, 3, D, D), lambda n, e, b: (e[n], 0, 0, 0)),  # Wq|Wk|Wv
            pl.BlockSpec((1, D, D), lambda n, e, b: (e[n], 0, 0)),        # Wo
            pl.BlockSpec((1, 3, 1, D), lambda n, e, b: (e[n], 0, 0, 0)),  # bq|bk|bv
            pl.BlockSpec((1, 1, D), lambda n, e, b: (e[n], 0, 0)),        # bo
        ],
        out_specs=pl.BlockSpec((1, S, D), lambda n, e, b: (n, 0, 0)),
    )

    expert_out = pl.pallas_call(
        kernel,
        out_shape=jax.ShapeDtypeStruct((N, S, D), jnp.float32),
        grid_spec=grid_spec,
        compiler_params=pltpu.CompilerParams(
            dimension_semantics=("parallel",),       # independent per selection
            vmem_limit_bytes=_vmem_limit_bytes()),
    )(sel_expert, sel_batch, q_bf, k_bf, v_bf, mask_bias, wqkv, wo, bqkv, bo)

    # ---- SparseDispatcher.combine: gate-weighted index_add + eps fill ----
    combined = jnp.zeros((B, S, D), jnp.float32).at[sel_batch].add(
        sel_gates[:, None, None] * expert_out)
    return jnp.where(combined == 0.0, zero_fill_eps, combined)


# ----------------------------------------------------------------------------
# Gating / loss glue (tiny compute; plain JAX)
# ----------------------------------------------------------------------------
def _prob_in_top_k(clean_values, noisy_values, noise_stddev, noisy_top_values, k):
    batch, m = noisy_top_values.shape
    top_values_flat = noisy_top_values.reshape(-1)
    thr_pos_if_in = jnp.arange(batch) * m + k
    thr_if_in = top_values_flat[thr_pos_if_in][:, None]
    is_in = noisy_values > thr_if_in
    thr_if_out = top_values_flat[thr_pos_if_in - 1][:, None]
    prob_if_in = jax.scipy.stats.norm.cdf((clean_values - thr_if_in) / noise_stddev)
    prob_if_out = jax.scipy.stats.norm.cdf((clean_values - thr_if_out) / noise_stddev)
    return jnp.where(is_in, prob_if_in, prob_if_out)


def noisy_top_k_gating(x, w_gate, w_noise, key, k, num_experts,
                       train=True, noise_epsilon=0.01, noisy_gating=True):
    # clean_logits accumulated over the sequence axis == x.sum(1) @ w_gate
    x_sum = jnp.sum(x, axis=1)                              # (B, D)
    clean_logits = x_sum @ w_gate                           # (B, E)
    raw_noise_stddev = x_sum @ w_noise
    if noisy_gating:
        noise_stddev = (jax.nn.softplus(raw_noise_stddev) + noise_epsilon) * float(train)
        noise = jax.random.normal(key, clean_logits.shape, dtype=clean_logits.dtype)
        noisy_logits = clean_logits + noise * noise_stddev
        logits = noisy_logits
    else:
        logits = clean_logits

    m = min(k + 1, num_experts)
    top_logits, top_indices = lax.top_k(logits, m)
    top_k_logits = top_logits[:, :k]
    top_k_indices = top_indices[:, :k]
    top_k_gates = jax.nn.softmax(top_k_logits, axis=1)

    B = x.shape[0]
    gates = jnp.zeros_like(logits).at[
        jnp.arange(B)[:, None], top_k_indices].set(top_k_gates)

    # Gate the smooth-load path on `train` so eval mode (noise_stddev == 0)
    # cannot produce inf/NaN in the aux loss.
    if noisy_gating and k < num_experts and train:
        load = _prob_in_top_k(clean_logits, noisy_logits, noise_stddev,
                              top_logits, k).sum(axis=0)
    else:
        load = (gates > 0).sum(axis=0).astype(jnp.float32)
    return gates, load, top_k_indices, top_k_gates


def cv_squared(x):
    eps = 1e-10
    if x.shape[0] == 1:
        return jnp.array(0.0, jnp.float32)
    x = x.astype(jnp.float32)
    return jnp.var(x, ddof=1) / (jnp.mean(x) ** 2 + eps)


def moe_mha_forward(q, k, v, mask, params, key, train=True, loss_coef=0.01):
    gates, load, top_k_indices, top_k_gates = noisy_top_k_gating(
        q, params["w_gate"], params["w_noise"], key,
        params["k"], params["num_experts"], train=train)
    importance = gates.sum(axis=0)
    loss = (cv_squared(importance) + cv_squared(load)) * loss_coef
    attn_output = moe_attention_pallas(top_k_indices, top_k_gates,
                                       q, k, v, mask, params)
    return attn_output, loss


# ----------------------------------------------------------------------------
# Driver
# ----------------------------------------------------------------------------
if __name__ == "__main__":
    # Lane-dense d_model (multiple of 128) so the kernel exercises the unmasked
    # store path; still small enough to run instantly.
    B, S, D, H = 2, 16, 128, 4        # batch, seq, d_model, heads (dk = 32)
    E, K = 4, 2                       # num_experts, top-k

    key = jax.random.PRNGKey(0)
    keys = jax.random.split(key, 16)
    bound = 1.0 / math.sqrt(D)

    def u(kk, shape):
        return jax.random.uniform(kk, shape, jnp.float32, -bound, bound)

    params = {
        "heads": H, "num_experts": E, "k": K,
        # __init__ uses torch.zeros for the gating parameters
        "w_gate": jnp.zeros((D, E), jnp.float32),
        "w_noise": jnp.zeros((D, E), jnp.float32),
        # per-expert MultiHeadAttention linear layers, stacked over experts
        "wq": u(keys[0], (E, D, D)), "wk": u(keys[1], (E, D, D)),
        "wv": u(keys[2], (E, D, D)), "wo": u(keys[3], (E, D, D)),
        "bq": u(keys[4], (E, 1, D)), "bk": u(keys[5], (E, 1, D)),
        "bv": u(keys[6], (E, 1, D)), "bo": u(keys[7], (E, 1, D)),
    }

    q = jax.random.normal(keys[8], (B, S, D), jnp.float32)
    k = jax.random.normal(keys[9], (B, S, D), jnp.float32)
    v = jax.random.normal(keys[10], (B, S, D), jnp.float32)
    mask = jnp.tril(jnp.ones((S, S), jnp.float32))[None]   # (1, S, S) causal (is_lm=True)

    out, loss = moe_mha_forward(q, k, v, mask, params, keys[11], train=True)
    jax.block_until_ready((out, loss))

    assert out.shape == (B, S, D)
    assert bool(jnp.all(jnp.isfinite(out))) and bool(jnp.isfinite(loss))
    print("KERNEL_OK")
</pallas_src>

<mosaic_0001>
module attributes {stable_mosaic.version = 11 : i64} {
  func.func @kernel(%arg0: i32, %arg1: memref<4xi32, #tpu.memory_space<smem>>, %arg2: memref<4xi32, #tpu.memory_space<smem>>, %arg3: memref<1x16x128xbf16, #tpu.memory_space<vmem>>, %arg4: memref<1x16x128xbf16, #tpu.memory_space<vmem>>, %arg5: memref<1x16x128xbf16, #tpu.memory_space<vmem>>, %arg6: memref<1x16x16xbf16, #tpu.memory_space<vmem>>, %arg7: memref<1x3x128x128xbf16, #tpu.memory_space<vmem>>, %arg8: memref<1x128x128xbf16, #tpu.memory_space<vmem>>, %arg9: memref<1x3x1x128xf32, #tpu.memory_space<vmem>>, %arg10: memref<1x1x128xf32, #tpu.memory_space<vmem>>, %arg11: memref<1x16x128xf32, #tpu.memory_space<vmem>>) attributes {dimension_semantics = [#tpu.dimension_semantics<parallel>], iteration_bounds = array<i64: 4>, scalar_prefetch = 2 : i64, scratch_operands = 0 : i64, tpu.core_type = #tpu.core_type<tc>, window_params = [{transform_indices = @transform_0, window_bounds = array<i64: 1, 16, 128>}, {transform_indices = @transform_1, window_bounds = array<i64: 1, 16, 128>}, {transform_indices = @transform_2, window_bounds = array<i64: 1, 16, 128>}, {pipeline_mode = #tpu.pipeline_mode<synchronous>, transform_indices = @transform_3, window_bounds = array<i64: 1, 16, 16>}, {transform_indices = @transform_4, window_bounds = array<i64: 1, 3, 128, 128>}, {transform_indices = @transform_5, window_bounds = array<i64: 1, 128, 128>}, {transform_indices = @transform_6, window_bounds = array<i64: 1, 3, 1, 128>}, {transform_indices = @transform_7, window_bounds = array<i64: 1, 1, 128>}, {transform_indices = @transform_8, window_bounds = array<i64: 1, 16, 128>}]} {
    %c0 = arith.constant 0 : index
    %c0_0 = arith.constant 0 : index
    %c0_1 = arith.constant 0 : index
    %0 = vector.load %arg3[%c0, %c0_0, %c0_1] : memref<1x16x128xbf16, #tpu.memory_space<vmem>>, vector<1x16x128xbf16>
    %1 = vector.shape_cast %0 : vector<1x16x128xbf16> to vector<16x128xbf16>
    %c0_2 = arith.constant 0 : index
    %c0_3 = arith.constant 0 : index
    %c0_4 = arith.constant 0 : index
    %2 = vector.load %arg4[%c0_2, %c0_3, %c0_4] : memref<1x16x128xbf16, #tpu.memory_space<vmem>>, vector<1x16x128xbf16>
    %3 = vector.shape_cast %2 : vector<1x16x128xbf16> to vector<16x128xbf16>
    %c0_5 = arith.constant 0 : index
    %c0_6 = arith.constant 0 : index
    %c0_7 = arith.constant 0 : index
    %4 = vector.load %arg5[%c0_5, %c0_6, %c0_7] : memref<1x16x128xbf16, #tpu.memory_space<vmem>>, vector<1x16x128xbf16>
    %5 = vector.shape_cast %4 : vector<1x16x128xbf16> to vector<16x128xbf16>
    %c0_8 = arith.constant 0 : index
    %c0_9 = arith.constant 0 : index
    %c0_10 = arith.constant 0 : index
    %6 = vector.load %arg6[%c0_8, %c0_9, %c0_10] : memref<1x16x16xbf16, #tpu.memory_space<vmem>>, vector<1x16x16xbf16>
    %7 = vector.shape_cast %6 : vector<1x16x16xbf16> to vector<16x16xbf16>
    %8 = arith.extf %7 : vector<16x16xbf16> to vector<16x16xf32>
    %c0_11 = arith.constant 0 : index
    %c0_12 = arith.constant 0 : index
    %c0_13 = arith.constant 0 : index
    %c0_14 = arith.constant 0 : index
    %9 = vector.load %arg7[%c0_11, %c0_12, %c0_13, %c0_14] : memref<1x3x128x128xbf16, #tpu.memory_space<vmem>>, vector<1x1x128x128xbf16>
    %10 = vector.shape_cast %9 : vector<1x1x128x128xbf16> to vector<128x128xbf16>
    %c0_15 = arith.constant 0 : index
    %c1 = arith.constant 1 : index
    %c0_16 = arith.constant 0 : index
    %c0_17 = arith.constant 0 : index
    %11 = vector.load %arg7[%c0_15, %c1, %c0_16, %c0_17] : memref<1x3x128x128xbf16, #tpu.memory_space<vmem>>, vector<1x1x128x128xbf16>
    %12 = vector.shape_cast %11 : vector<1x1x128x128xbf16> to vector<128x128xbf16>
    %c0_18 = arith.constant 0 : index
    %c2 = arith.constant 2 : index
    %c0_19 = arith.constant 0 : index
    %c0_20 = arith.constant 0 : index
    %13 = vector.load %arg7[%c0_18, %c2, %c0_19, %c0_20] : memref<1x3x128x128xbf16, #tpu.memory_space<vmem>>, vector<1x1x128x128xbf16>
    %14 = vector.shape_cast %13 : vector<1x1x128x128xbf16> to vector<128x128xbf16>
    %c0_21 = arith.constant 0 : index
    %c0_22 = arith.constant 0 : index
    %c0_23 = arith.constant 0 : index
    %c0_24 = arith.constant 0 : index
    %15 = vector.load %arg9[%c0_21, %c0_22, %c0_23, %c0_24] : memref<1x3x1x128xf32, #tpu.memory_space<vmem>>, vector<1x1x1x128xf32>
    %16 = vector.shape_cast %15 : vector<1x1x1x128xf32> to vector<1x128xf32>
    %c0_25 = arith.constant 0 : index
    %c1_26 = arith.constant 1 : index
    %c0_27 = arith.constant 0 : index
    %c0_28 = arith.constant 0 : index
    %17 = vector.load %arg9[%c0_25, %c1_26, %c0_27, %c0_28] : memref<1x3x1x128xf32, #tpu.memory_space<vmem>>, vector<1x1x1x128xf32>
    %18 = vector.shape_cast %17 : vector<1x1x1x128xf32> to vector<1x128xf32>
    %c0_29 = arith.constant 0 : index
    %c2_30 = arith.constant 2 : index
    %c0_31 = arith.constant 0 : index
    %c0_32 = arith.constant 0 : index
    %19 = vector.load %arg9[%c0_29, %c2_30, %c0_31, %c0_32] : memref<1x3x1x128xf32, #tpu.memory_space<vmem>>, vector<1x1x1x128xf32>
    %20 = vector.shape_cast %19 : vector<1x1x1x128xf32> to vector<1x128xf32>
    %c0_33 = arith.constant 0 : index
    %c0_34 = arith.constant 0 : index
    %c0_35 = arith.constant 0 : index
    %21 = vector.load %arg8[%c0_33, %c0_34, %c0_35] : memref<1x128x128xbf16, #tpu.memory_space<vmem>>, vector<1x128x128xbf16>
    %22 = vector.shape_cast %21 : vector<1x128x128xbf16> to vector<128x128xbf16>
    %c0_36 = arith.constant 0 : index
    %c0_37 = arith.constant 0 : index
    %c0_38 = arith.constant 0 : index
    %23 = vector.load %arg10[%c0_36, %c0_37, %c0_38] : memref<1x1x128xf32, #tpu.memory_space<vmem>>, vector<1x1x128xf32>
    %24 = vector.shape_cast %23 : vector<1x1x128xf32> to vector<1x128xf32>
    %cst = arith.constant dense<0.000000e+00> : vector<16x128xf32>
    %25 = tpu.matmul %1, %10, %cst {dimension_numbers = #tpu.dot_dimension_numbers<[1], [0], [0], [1], [0, 0, 1, 1], [], []>} : vector<16x128xbf16>, vector<128x128xbf16>, vector<16x128xf32> -> vector<16x128xf32>
    %26 = vector.broadcast %16 : vector<1x128xf32> to vector<16x128xf32>
    %27 = arith.addf %25, %26 : vector<16x128xf32>
    %cst_39 = arith.constant dense<0.000000e+00> : vector<16x128xf32>
    %28 = tpu.matmul %3, %12, %cst_39 {dimension_numbers = #tpu.dot_dimension_numbers<[1], [0], [0], [1], [0, 0, 1, 1], [], []>} : vector<16x128xbf16>, vector<128x128xbf16>, vector<16x128xf32> -> vector<16x128xf32>
    %29 = vector.broadcast %18 : vector<1x128xf32> to vector<16x128xf32>
    %30 = arith.addf %28, %29 : vector<16x128xf32>
    %cst_40 = arith.constant dense<0.000000e+00> : vector<16x128xf32>
    %31 = tpu.matmul %5, %14, %cst_40 {dimension_numbers = #tpu.dot_dimension_numbers<[1], [0], [0], [1], [0, 0, 1, 1], [], []>} : vector<16x128xbf16>, vector<128x128xbf16>, vector<16x128xf32> -> vector<16x128xf32>
    %32 = vector.broadcast %20 : vector<1x128xf32> to vector<16x128xf32>
    %33 = arith.addf %31, %32 : vector<16x128xf32>
    %cst_41 = arith.constant 0.176776692 : f32
    %34 = vector.broadcast %cst_41 : f32 to vector<16x128xf32>
    %35 = arith.mulf %27, %34 : vector<16x128xf32>
    %36 = vector.shape_cast %35 : vector<16x128xf32> to vector<16x4x32xf32>
    %37 = tpu.transpose %36, [1, 0, 2] : vector<16x4x32xf32> -> vector<4x16x32xf32>
    %38 = arith.truncf %37 : vector<4x16x32xf32> to vector<4x16x32xbf16>
    %39 = vector.shape_cast %30 : vector<16x128xf32> to vector<16x4x32xf32>
    %40 = tpu.transpose %39, [1, 0, 2] : vector<16x4x32xf32> -> vector<4x16x32xf32>
    %41 = arith.truncf %40 : vector<4x16x32xf32> to vector<4x16x32xbf16>
    %42 = vector.shape_cast %33 : vector<16x128xf32> to vector<16x4x32xf32>
    %43 = tpu.transpose %42, [1, 0, 2] : vector<16x4x32xf32> -> vector<4x16x32xf32>
    %44 = arith.truncf %43 : vector<4x16x32xf32> to vector<4x16x32xbf16>
    %cst_42 = arith.constant dense<0.000000e+00> : vector<4x16x16xf32>
    %45 = tpu.matmul %38, %41, %cst_42 {dimension_numbers = #tpu.dot_dimension_numbers<[2], [2], [1], [1], [0, 0, 0, 1, 1, 1], [0], [0]>} : vector<4x16x32xbf16>, vector<4x16x32xbf16>, vector<4x16x16xf32> -> vector<4x16x16xf32>
    %46 = vector.shape_cast %8 : vector<16x16xf32> to vector<1x16x16xf32>
    %47 = vector.broadcast %46 : vector<1x16x16xf32> to vector<4x16x16xf32>
    %48 = arith.addf %45, %47 : vector<4x16x16xf32>
    %cst_43 = arith.constant dense<0xFF800000> : vector<4x16xf32>
    %49 = vector.multi_reduction <maximumf>, %48, %cst_43 [2] : vector<4x16x16xf32> to vector<4x16xf32>
    %50 = vector.shape_cast %49 : vector<4x16xf32> to vector<4x16x1xf32>
    %51 = vector.broadcast %50 : vector<4x16x1xf32> to vector<4x16x16xf32>
    %52 = arith.subf %48, %51 : vector<4x16x16xf32>
    %53 = math.exp %52 : vector<4x16x16xf32>
    %cst_44 = arith.constant dense<0.000000e+00> : vector<4x16xf32>
    %54 = vector.multi_reduction <add>, %53, %cst_44 [2] : vector<4x16x16xf32> to vector<4x16xf32>
    %55 = vector.shape_cast %54 : vector<4x16xf32> to vector<4x16x1xf32>
    %56 = tpu.reciprocal %55 {approx = true} : vector<4x16x1xf32> -> vector<4x16x1xf32>
    %57 = vector.broadcast %56 : vector<4x16x1xf32> to vector<4x16x16xf32>
    %58 = arith.mulf %53, %57 : vector<4x16x16xf32>
    %59 = arith.truncf %58 : vector<4x16x16xf32> to vector<4x16x16xbf16>
    %cst_45 = arith.constant dense<0.000000e+00> : vector<4x16x32xf32>
    %60 = tpu.matmul %59, %44, %cst_45 {dimension_numbers = #tpu.dot_dimension_numbers<[2], [1], [1], [2], [0, 0, 0, 1, 1, 2], [0], [0]>} : vector<4x16x16xbf16>, vector<4x16x32xbf16>, vector<4x16x32xf32> -> vector<4x16x32xf32>
    %61 = tpu.transpose %60, [1, 0, 2] : vector<4x16x32xf32> -> vector<16x4x32xf32>
    %62 = vector.shape_cast %61 : vector<16x4x32xf32> to vector<16x128xf32>
    %63 = arith.truncf %62 : vector<16x128xf32> to vector<16x128xbf16>
    %cst_46 = arith.constant dense<0.000000e+00> : vector<16x128xf32>
    %64 = tpu.matmul %63, %22, %cst_46 {dimension_numbers = #tpu.dot_dimension_numbers<[1], [0], [0], [1], [0, 0, 1, 1], [], []>} : vector<16x128xbf16>, vector<128x128xbf16>, vector<16x128xf32> -> vector<16x128xf32>
    %65 = vector.broadcast %24 : vector<1x128xf32> to vector<16x128xf32>
    %66 = arith.addf %64, %65 : vector<16x128xf32>
    %67 = vector.shape_cast %66 : vector<16x128xf32> to vector<1x16x128xf32>
    %c0_47 = arith.constant 0 : index
    %c0_48 = arith.constant 0 : index
    %c0_49 = arith.constant 0 : index
    %68 = vector.load %arg11[%c0_47, %c0_48, %c0_49] : memref<1x16x128xf32, #tpu.memory_space<vmem>>, vector<1x16x128xf32>
    tpu.vector_store %arg11[%c0_47, %c0_48, %c0_49], %67 {strides = array<i32>} : memref<1x16x128xf32, #tpu.memory_space<vmem>>, vector<1x16x128xf32>,
    return
  }
  func.func @transform_0(%arg0: i32, %arg1: memref<4xi32, #tpu.memory_space<smem>>, %arg2: memref<4xi32, #tpu.memory_space<smem>>) -> (i32, i32, i32) {
    %0 = arith.index_cast %arg0 : i32 to index
    %1 = memref.load %arg2[%0] : memref<4xi32, #tpu.memory_space<smem>>
    %c0_i32 = arith.constant 0 : i32
    %c0_i32_0 = arith.constant 0 : i32
    %c0_i32_1 = arith.constant 0 : i32
    return %1, %c0_i32, %c0_i32_0 : i32, i32, i32
  }
  func.func @transform_1(%arg0: i32, %arg1: memref<4xi32, #tpu.memory_space<smem>>, %arg2: memref<4xi32, #tpu.memory_space<smem>>) -> (i32, i32, i32) {
    %0 = arith.index_cast %arg0 : i32 to index
    %1 = memref.load %arg2[%0] : memref<4xi32, #tpu.memory_space<smem>>
    %c0_i32 = arith.constant 0 : i32
    %c0_i32_0 = arith.constant 0 : i32
    %c0_i32_1 = arith.constant 0 : i32
    return %1, %c0_i32, %c0_i32_0 : i32, i32, i32
  }
  func.func @transform_2(%arg0: i32, %arg1: memref<4xi32, #tpu.memory_space<smem>>, %arg2: memref<4xi32, #tpu.memory_space<smem>>) -> (i32, i32, i32) {
    %0 = arith.index_cast %arg0 : i32 to index
    %1 = memref.load %arg2[%0] : memref<4xi32, #tpu.memory_space<smem>>
    %c0_i32 = arith.constant 0 : i32
    %c0_i32_0 = arith.constant 0 : i32
    %c0_i32_1 = arith.constant 0 : i32
    return %1, %c0_i32, %c0_i32_0 : i32, i32, i32
  }
  func.func @transform_3(%arg0: i32, %arg1: memref<4xi32, #tpu.memory_space<smem>>, %arg2: memref<4xi32, #tpu.memory_space<smem>>) -> (i32, i32, i32) {
    %c0_i32 = arith.constant 0 : i32
    %c0_i32_0 = arith.constant 0 : i32
    %c0_i32_1 = arith.constant 0 : i32
    %c0_i32_2 = arith.constant 0 : i32
    return %c0_i32, %c0_i32_0, %c0_i32_1 : i32, i32, i32
  }
  func.func @transform_4(%arg0: i32, %arg1: memref<4xi32, #tpu.memory_space<smem>>, %arg2: memref<4xi32, #tpu.memory_space<smem>>) -> (i32, i32, i32, i32) {
    %0 = arith.index_cast %arg0 : i32 to index
    %1 = memref.load %arg1[%0] : memref<4xi32, #tpu.memory_space<smem>>
    %c0_i32 = arith.constant 0 : i32
    %c0_i32_0 = arith.constant 0 : i32
    %c0_i32_1 = arith.constant 0 : i32
    %c0_i32_2 = arith.constant 0 : i32
    return %1, %c0_i32, %c0_i32_0, %c0_i32_1 : i32, i32, i32, i32
  }
  func.func @transform_5(%arg0: i32, %arg1: memref<4xi32, #tpu.memory_space<smem>>, %arg2: memref<4xi32, #tpu.memory_space<smem>>) -> (i32, i32, i32) {
    %0 = arith.index_cast %arg0 : i32 to index
    %1 = memref.load %arg1[%0] : memref<4xi32, #tpu.memory_space<smem>>
    %c0_i32 = arith.constant 0 : i32
    %c0_i32_0 = arith.constant 0 : i32
    %c0_i32_1 = arith.constant 0 : i32
    return %1, %c0_i32, %c0_i32_0 : i32, i32, i32
  }
  func.func @transform_6(%arg0: i32, %arg1: memref<4xi32, #tpu.memory_space<smem>>, %arg2: memref<4xi32, #tpu.memory_space<smem>>) -> (i32, i32, i32, i32) {
    %0 = arith.index_cast %arg0 : i32 to index
    %1 = memref.load %arg1[%0] : memref<4xi32, #tpu.memory_space<smem>>
    %c0_i32 = arith.constant 0 : i32
    %c0_i32_0 = arith.constant 0 : i32
    %c0_i32_1 = arith.constant 0 : i32
    %c0_i32_2 = arith.constant 0 : i32
    return %1, %c0_i32, %c0_i32_0, %c0_i32_1 : i32, i32, i32, i32
  }
  func.func @transform_7(%arg0: i32, %arg1: memref<4xi32, #tpu.memory_space<smem>>, %arg2: memref<4xi32, #tpu.memory_space<smem>>) -> (i32, i32, i32) {
    %0 = arith.index_cast %arg0 : i32 to index
    %1 = memref.load %arg1[%0] : memref<4xi32, #tpu.memory_space<smem>>
    %c0_i32 = arith.constant 0 : i32
    %c0_i32_0 = arith.constant 0 : i32
    %c0_i32_1 = arith.constant 0 : i32
    return %1, %c0_i32, %c0_i32_0 : i32, i32, i32
  }
  func.func @transform_8(%arg0: i32, %arg1: memref<4xi32, #tpu.memory_space<smem>>, %arg2: memref<4xi32, #tpu.memory_space<smem>>) -> (i32, i32, i32) {
    %c0_i32 = arith.constant 0 : i32
    %c0_i32_0 = arith.constant 0 : i32
    %c0_i32_1 = arith.constant 0 : i32
    return %arg0, %c0_i32, %c0_i32_0 : i32, i32, i32
  }
}

</mosaic_0001>

<bundles_post_ra>
// kernel: tpu_custom_call.1
= control target key start
LH: loop header
LB: loop body
LE: loop exit
PB: predicated region body
PF: predicated region fallthrough
CT: control target
= control target key end

     0   :  { %s3596_s19 = smov [#allocation3]   ;;  %s3597_s20 = smov [#allocation4]   ;;  %s4975_s0 = inlined_call_operand.hbm [shape: s32[4], index: 0, kind: input, shape index: {}]   ;;  %s4976_s2 = inlined_call_operand.hbm [shape: bf16[2,16,128], index: 2, kind: input, shape index: {}]   ;;  %s4977_s3 = inlined_call_operand.hbm [shape: bf16[2,16,128], index: 3, kind: input, shape index: {}]   ;;  %s4978_s4 = inlined_call_operand.hbm [shape: bf16[2,16,128], index: 4, kind: input, shape index: {}]   ;;  %s4979_s5 = inlined_call_operand.hbm [shape: bf16[1,16,16], index: 5, kind: input, shape index: {}]   ;;  %s4980_s6 = inlined_call_operand.hbm [shape: bf16[4,3,128,128], index: 6, kind: input, shape index: {}]   ;;  %s4981_s7 = inlined_call_operand.hbm [shape: bf16[4,128,128], index: 7, kind: input, shape index: {}]   ;;  %s4982_s8 = inlined_call_operand.hbm [shape: f32[4,3,1,128], index: 8, kind: input, shape index: {}]   ;;  %s4983_s9 = inlined_call_operand.vmem [shape: f32[4,1,128], index: 9, kind: input, shape index: {}]   ;;  %s4984_s10 = inlined_call_operand.hbm [shape: f32[4,16,128], index: 10, kind: output, shape index: {}]   ;;  %s4985_s1 = inlined_call_operand.hbm [shape: s32[4], index: 1, kind: input, shape index: {}]  }
   0x1   :  { %5030 = sst [smem:[#allocation65_spill]] %s4976_s2  ;;  %s16_s15 = sshll.u32 %s4975_s0, 4  ;;  %s17_s15 = int_to_ptr.hbm [resolvable:$true] %s16_s15 }
   0x2   :  { %5031 = sst [smem:[#allocation66_spill]] %s4977_s3  ;;  %s21_s18 = sshll.u32 %s4985_s1, 4  ;;  %s22_s18 = int_to_ptr.hbm [resolvable:$true] %s21_s18 }
   0x3   :  { %5032 = sst [smem:[#allocation67_spill]] %s4978_s4 }
   0x4   :  { %5033 = sst [smem:[#allocation68_spill]] %s4979_s5 }
   0x5   :  { %5034 = sst [smem:[#allocation69_spill]] %s4980_s6 }
   0x6   :  { %5035 = sst [smem:[#allocation70_spill]] %s4981_s7 }
   0x7   :  { %5036 = sst [smem:[#allocation71_spill]] %s4982_s8 }
   0x8   :  { %5037 = sst [smem:[#allocation72_spill]] %s4983_s9 }
   0x9   :  { %5038 = sst [smem:[#allocation73_spill]] %s4984_s10 }
   0xa   :  { %19 = dma.hbm_to_smem %s17_s15, 16, %s3596_s19, [#allocation2] }
   0xb   :  { %24 = dma.hbm_to_smem %s22_s18, 16, %s3597_s20, [#allocation2] }
   0xc   :  { %3474 = dma.done.wait [#allocation2], 32 }
   0xd   :  { %3475 = vsyncadd [#allocation2], 4294967264 }
   0xe   :  { %27 = sfence }
   0xf   :  { %28 = vsyncpa [#allocation6], 0 }
  0x10   :  { %30 = vsyncpa [#allocation6 + $0x1], 0 }
  0x11   :  { %31 = vsyncpa [#allocation9], 0 }
  0x12   :  { %33 = vsyncpa [#allocation9 + $0x1], 0 }
  0x13   :  { %34 = vsyncpa [#allocation12], 0 }
  0x14   :  { %35 = vsyncpa [#allocation7], 0 }
  0x15   :  { %37 = vsyncpa [#allocation7 + $0x1], 0  ;;  %s3671_s0 = smov 0   ;;  %s3673_s21 = smov 0  }
  0x16   :  { %s3675_s1 = smov 0   ;;  %s3677_s22 = smov 0  }
  0x17   :  { %s3679_s23 = smov 0   ;;  %s3681_s24 = smov 0  }
  0x18   :  { %s3683_s25 = smov 0   ;;  %s3685_s26 = smov 0  }
  0x19   :  { %s3687_s27 = smov 0   ;;  %s3689_s28 = smov 0  }
  0x1a   :  { %s3691_s29 = smov 0   ;;  %s3693_s30 = smov 0  }
  0x1b   :  { %s3695_s11 = smov 0   ;;  %s3697_s12 = smov 0  }
  0x1c   :  { %s3699_s13 = smov 0   ;;  %s3701_s14 = smov 0  }
  0x1d   :  { %s3703_s15 = smov 0   ;;  %s3705_s16 = smov 0  }
  0x1e   :  { %s3707_s17 = smov 0   ;;  %s3709_s18 = smov 0  }
  0x1f   :  { %s3711_s19 = smov 0   ;;  %s3713_s20 = smov 0  }
  0x20 LB: > { %5039 = sst [smem:[#allocation38_spill]] %s3510_s0  ;;  %s3780_s10 = sadd.s32 4294967295, %s3594_s20   ;;  %s3594_s20 = sphi %s3713_s20, %s5162_s20   ;;  %s3590_s19 = sphi %s3711_s19, %s5180_s19   ;;  %s3586_s18 = sphi %s3709_s18, %s5179_s18   ;;  %s3582_s17 = sphi %s3707_s17, %s5178_s17   ;;  %s3578_s16 = sphi %s3705_s16, %s5177_s16   ;;  %s3574_s15 = sphi %s3703_s15, %s5185_s15   ;;  %s3570_s14 = sphi %s3701_s14, %s5184_s14   ;;  %s3566_s13 = sphi %s3699_s13, %s5175_s13   ;;  %s3562_s12 = sphi %s3697_s12, %s5174_s12   ;;  %s3558_s11 = sphi %s3695_s11, %s5173_s11   ;;  %s3554_s30 = sphi %s3693_s30, %s5172_s30   ;;  %s3550_s29 = sphi %s3691_s29, %s5183_s29   ;;  %s3546_s28 = sphi %s3689_s28, %s5182_s28   ;;  %s3542_s27 = sphi %s3687_s27, %s5170_s27   ;;  %s3538_s26 = sphi %s3685_s26, %s5169_s26   ;;  %s3534_s25 = sphi %s3683_s25, %s5168_s25   ;;  %s3530_s24 = sphi %s3681_s24, %s5209_s24   ;;  %s3526_s23 = sphi %s3679_s23, %s5167_s23   ;;  %s3522_s22 = sphi %s3677_s22, %s5166_s22   ;;  %s3518_s1 = sphi %s3675_s1, %s5165_s1   ;;  %s3514_s21 = sphi %s3673_s21, %s5164_s21   ;;  %s3510_s0 = sphi %s3671_s0, %s5163_s0  }
  0x21   : > { %5040 = sst [smem:[#allocation39_spill]] %s3514_s21  ;;  %s2504_s9 = sadd.s32 4294967294, %s3594_s20  }
  0x22   : > { %5041 = sst [smem:[#allocation40_spill]] %s3518_s1  ;;  %s3784_s8 = sadd.s32 1, %s3594_s20  }
  0x23   : > { %5042 = sst [smem:[#allocation41_spill]] %s3522_s22  ;;  %p59_p0 = scmp.ne.s32.totalorder %s3590_s19, %s3586_s18 }
  0x24   : > { %5043 = sst [smem:[#allocation42_spill]] %s3526_s23  ;;  %p5006_p1 = scmp.eq.s32.totalorder %s3594_s20, 0 }
  0x25   : > { %5044 = sst [smem:[#allocation43_spill]] %s3530_s24  ;;  %s52_s24 = sadd.s32 1, %s3590_s19 }
  0x26   : > { %5045 = sst [smem:[#allocation44_spill]] %s3534_s25  ;;  %p65_p2 = scmp.ne.s32.totalorder %s3586_s18, %s3582_s17 }
  0x27   : > { %5046 = sst [smem:[#allocation45_spill]] %s3538_s26  ;;  %p5005_p3 = scmp.eq.s32.totalorder %s3780_s10, 0 }
  0x28   : > { %5047 = sst [smem:[#allocation46_spill]] %s3542_s27  ;;  %p3796_p4 = por %p5006_p1, %p59_p0 }
  0x29   : > { %5048 = sst [smem:[#allocation47_spill]] %s3554_s30  ;;  %s264_s25 = ssub.s32 %s3594_s20, %s3784_s8 }
  0x2a   : > { %5049 = sst [smem:[#allocation48_spill]] %s3562_s12  ;;  %p3804_p5 = por %p5005_p3, %p65_p2 }
  0x2b   : > { %5050 = sst [smem:[#allocation49_spill]] %s3566_s13  ;;  %p265_p6 = scmp.eq.s32.totalorder %s264_s25, 0 }
  0x2c   : > { %5051 = sst [smem:[#allocation50_spill]] %s3578_s16  ;;  %s267_s26 = sadd.s32 1, %s3518_s1 }
  0x2d   : > { %5052 = sst [smem:[#allocation51_spill]] %s3586_s18  ;;  %p277_p7 = scmp.ne.s32.totalorder %s3518_s1, %s3514_s21 }
  0x2e   : > { %5053 = sst [smem:[#allocation52_spill]] %s3590_s19  ;;  %p278_p8 = scmp.eq.s32.totalorder %s3780_s10, 3 }
  0x2f   : > { %5054 = sst [smem:[#allocation53_spill]] %s3784_s8  ;;  %p283_p10 = scmp.ne.s32.totalorder %s3514_s21, %s3510_s0 }
  0x30   : > { %s47_s7 = sld [smem:[#allocation4 + %s3594_s20]]  ;;  %p3820_p11 = por %p278_p8, %p277_p7 }
  0x31   : > { %s48_s22 = sld [smem:[#allocation4 + %s3784_s8]]  ;;  %p284_p12 = scmp.eq.s32.totalorder %s2504_s9, 3 }
  0x32   : > { %s5056_s27 = scalar_select %p3804_p5, 1, 0 }
  0x33   : > { %s3815_s18 = scalar_select %p265_p6, %s3518_s1, %s267_s26  }
  0x34   : > { %5057 = sst [smem:[#allocation54_spill]] %s5056_s27  ;;  %p3824_p13 = por %p284_p12, %p283_p10 }
  0x35   : > { %5058 = sst [smem:[#allocation55_spill]] %s3815_s18  ;;  %p5007_p0 = scmp.lt.s32.totalorder %s3594_s20, 4 }
  0x36   : > { %s5060_s27 = scalar_select %p3820_p11, 1, 0 }
  0x37   : > { %s49_s17 = ssub.s32 %s47_s7, %s48_s22  ;;  %s320_s22 = sand.u32 1, %s3590_s19  }
  0x38   : > { %p50_p9 = scmp.eq.s32.totalorder %s49_s17, 0  ;;  %5061 = sst [smem:[#allocation57_spill]] %s5060_s27 }
  0x39   : > { %s5062_s25 = scalar_select %p3824_p13, 1, 0 }
  0x3a   : > { %s3818_s6 = scalar_select %p50_p9, %s3590_s19, %s52_s24  }
  0x3b   : > { %5063 = sst [smem:[#allocation58_spill]] %s5062_s25  ;;  %s2508_s24 = sshll.u32 %s320_s22, 3 }
  0x3c   : > { %5059 = sst [smem:[#allocation56_spill]] %s3818_s6  ;;  %p3835_p2 = pnand %p5007_p0, %p3796_p4 }
  0x3d   : > { %s2767_s9 = scalar_select %p3796_p4, [#allocation4], [#allocation17] }
  0x3e   : > { %s2768_s17 = scalar_select %p3796_p4, %s3594_s20, 0 }
  0x3f   : > { %s5187_s9 = smov (!%p5007_p0, %s2767_s9), [#allocation23]  ;;  %s322_s7 = scalar_lea.vmem [#allocation5], %s2508_s24 }
  0x40   : > { %s5189_s17 = smov (!%p5007_p0, %s2768_s17), 0  ;;  %s3848_s6 = sshll.u32 %s322_s7, 4 }
  0x41   : > { %5065 = sst [smem:[#allocation59_spill]] %s3848_s6  ;;  %p87_p6 = scmp.ne.s32.totalorder %s3578_s16, %s3574_s15 }
  0x42   : > { %s323_s22 = sld [smem:[%s5187_s9 + %s5189_s17]]  ;;  %p93_p4 = scmp.ne.s32.totalorder %s3574_s15, %s3570_s14 }
  0x43   : > { %s3852_s19 = sld [smem:[#allocation4 + %s3594_s20]]  ;;  %p3867_p7 = por %p87_p6, %p5006_p1 }
  0x44   : > { %s3856_s1 = sld [smem:[#allocation4 + %s3784_s8]]  ;;  %p3873_p8 = por %p93_p4, %p5005_p3 }
  0x45   : > { %s5066_s2 = sld [smem:[#allocation65_spill]]  ;;  %s5069_s17 = sand.u32 1, %s3594_s20  }
  0x46   : > { %s3879_s18 = scalar_lea.sflag [#allocation6], %s5069_s17  ;;  %p3152_p10 = pneg %p3835_p2 }
  0x48   : > { %s2715_s23 = sshll.u32 %s323_s22, 3 }
  0x4b   : > { %s328_s27 = scalar_lea.hbm %s5066_s2, %s2715_s23 }
  0x4c   : > { %s329_s24 = sshll.u32 %s328_s27, 4  ;;  %s3155_s27 = scalar_lea.hbm %s5066_s2, 16  ;;  %s330_s24 = int_to_ptr.hbm [resolvable:$true] %s329_s24 }
  0x4d   : > { %s3148_s14 = sshra.s32 %s330_s24, 4  ;;  %s3149_s14 = int_to_ptr.hbm [resolvable:$true] %s3148_s14 }
  0x4e   : > { %s3150_s22 = scalar_lea.hbm %s3149_s14, 8  ;;  %p3156_p4 = scmp.lt.s32.totalorder %s3149_s14, %s5066_s2 }
  0x4f   : > { %p3151_p9 = scmp.ne.s32.totalorder %s3149_s14, %s3150_s22  ;;  %p3157_p3 = scmp.lt.s32.totalorder %s3155_s27, %s3150_s22 }
  0x51   : > { %p3153_p12 = pnand %p3152_p10, %p3151_p9  ;;  %p3158_p1 = por %p3157_p3, %p3156_p4 }
  0x53   : > { %p3154_p6 = pneg %p3153_p12 }
  0x55   : > { %p3159_p0 = pnand %p3158_p1, %p3154_p6 }
  0x57   : > { %3162 = shalt.err (!%p3159_p0)
}
  0x58   : > { %s5009_s17 = smov 64   ;;  %s5070_s21 = sld [smem:[#allocation59_spill]] }
  0x59   : > { %s5011_s6 = smov 4   ;;  %s77_s22 = ssub.s32 %s3852_s19, %s3856_s1 }
  0x5a   : > { %s343_s0 = sand.u32 1, %s3578_s16   ;;  %p78_p1 = scmp.eq.s32.totalorder %s77_s22, 0 }
  0x5b   : > { %s2511_s25 = sshll.u32 %s343_s0, 3  ;;  %p5072_p3 = scmp.lt.s32.totalorder %s3594_s20, 4 }
  0x5c   : > { %s5074_s27 = sadd.s32 1, %s3578_s16  ;;  %s3926_s0 = sld [smem:[#allocation4 + %s3594_s20]] }
  0x5d   : > { %p3904_p0 = pnand %p5072_p3, %p3867_p7  ;;  %p121_p10 = scmp.ne.s32.totalorder %s3562_s12, %s3558_s11 }
  0x5e   : > { %s5071_s14 = int_to_ptr.vmem [resolvable:$true] %s5070_s21  ;;  %s5079_s3 = sld [smem:[#allocation66_spill]] }
  0x5f   : > { %2804 = dma.hbm_to_vmem [thread:$0]  (!%p3835_p2), %s330_s24, 128, %s5071_s14, %s3879_s18, %s5009_s17, %s5009_s17, %s5011_s6  }
  0x60   : > { %s3911_s21 = scalar_select %p78_p1, %s3578_s16, %s5074_s27  }
  0x61   : > { %s2770_s1 = scalar_select %p3867_p7, [#allocation4], [#allocation18] }
  0x62   : > { %5075 = sst [smem:[#allocation60_spill]] %s3911_s21  ;;  %p5076_p2 = pmov %p5072_p3 }
  0x63   : > { %s2771_s19 = scalar_select %p3867_p7, %s3594_s20, 0 }
  0x64   : > { %s5191_s1 = smov (!%p5076_p2, %s2770_s1), [#allocation24]  ;;  %p5077_p9 = pmov %p5076_p2 }
  0x65   : > { %s345_s24 = scalar_lea.vmem [#allocation8], %s2511_s25  ;;  %s3930_s21 = sld [smem:[#allocation4 + %s3784_s8]] }
  0x66   : > { %s5193_s19 = smov (!%p5077_p9, %s2771_s19), 0  ;;  %s3922_s14 = sshll.u32 %s345_s24, 4 }
  0x67   : > { %5078 = sst [smem:[#allocation59_spill]] %s3922_s14  ;;  %p115_p7 = scmp.ne.s32.totalorder %s3566_s13, %s3562_s12 }
  0x68   : > { %s346_s22 = sld [smem:[%s5191_s1 + %s5193_s19]]  ;;  %p5080_p12 = scmp.eq.s32.totalorder %s3594_s20, 0 }
  0x69   : > { %p5082_p4 = scmp.eq.s32.totalorder %s3780_s10, 0  ;;  %s366_s24 = sand.u32 1, %s3566_s13  }
  0x6a   : > { %p3941_p6 = por %p115_p7, %p5080_p12  ;;  %s5085_s27 = sand.u32 1, %s3594_s20  }
  0x6b   : > { %p3947_p1 = por %p121_p10, %p5082_p4  ;;  %p3182_p2 = pneg %p3904_p0 }
  0x6d   : > { %s5083_s19 = scalar_select %p3947_p1, 1, 0 }
  0x6e   : > { %s2716_s7 = sshll.u32 %s346_s22, 3  ;;  %s3954_s22 = scalar_lea.sflag [#allocation9], %s5085_s27 }
  0x6f   : > { %s351_s2 = scalar_lea.hbm %s5079_s3, %s2716_s7  ;;  %5084 = sst [smem:[#allocation61_spill]] %s5083_s19 }
  0x70   : > { %s352_s1 = sshll.u32 %s351_s2, 4  ;;  %s3185_s7 = scalar_lea.hbm %s5079_s3, 16  ;;  %s353_s1 = int_to_ptr.hbm [resolvable:$true] %s352_s1 }
  0x71   : > { %s3178_s11 = sshra.s32 %s353_s1, 4  ;;  %s3179_s11 = int_to_ptr.hbm [resolvable:$true] %s3178_s11 }
  0x72   : > { %s3180_s17 = scalar_lea.hbm %s3179_s11, 8  ;;  %p3186_p10 = scmp.lt.s32.totalorder %s3179_s11, %s5079_s3 }
  0x73   : > { %p3181_p3 = scmp.ne.s32.totalorder %s3179_s11, %s3180_s17  ;;  %p3187_p12 = scmp.lt.s32.totalorder %s3185_s7, %s3180_s17 }
  0x75   : > { %p3183_p9 = pnand %p3182_p2, %p3181_p3  ;;  %p3188_p4 = por %p3187_p12, %p3186_p10 }
  0x77   : > { %p3184_p7 = pneg %p3183_p9 }
  0x79   : > { %p3189_p13 = pnand %p3188_p4, %p3184_p7 }
  0x7b   : > { %3192 = shalt.err (!%p3189_p13)
}
  0x7c   : > { %s5086_s27 = smov 4   ;;  %s5087_s16 = smov 64  }
  0x7d   : > { %s5088_s19 = sld [smem:[#allocation59_spill]]  ;;  %s105_s26 = ssub.s32 %s3926_s0, %s3930_s21 }
  0x7e   : > { %s2514_s23 = sshll.u32 %s366_s24, 3  ;;  %p106_p13 = scmp.eq.s32.totalorder %s105_s26, 0 }
  0x7f   : > { %s2773_s14 = scalar_select %p3941_p6, [#allocation4], [#allocation19] }
  0x80   : > { %s2774_s17 = scalar_select %p3941_p6, %s3594_s20, 0 }
  0x81   : > { %p5092_p3 = scmp.lt.s32.totalorder %s3594_s20, 4  ;;  %s4000_s24 = sld [smem:[#allocation3 + %s3594_s20]] }
  0x82   : > { %s153_s6 = sld [smem:[#allocation3 + %s3784_s8]]  ;;  %s157_s2 = sadd.s32 1, %s3554_s30 }
  0x83   : > { %s5089_s12 = int_to_ptr.vmem [resolvable:$true] %s5088_s19  ;;  %s5090_s19 = sadd.s32 1, %s3566_s13 }
  0x84   : > { %2809 = dma.hbm_to_vmem [thread:$0]  (!%p3904_p0), %s353_s1, 128, %s5089_s12, %s3954_s22, %s5087_s16, %s5087_s16, %s5086_s27  }
  0x85   : > { %s3979_s11 = scalar_select %p106_p13, %s3566_s13, %s5090_s19  }
  0x86   : > { %s5195_s14 = smov (!%p5092_p3, %s2773_s14), [#allocation25]  ;;  %p5093_p2 = pmov %p5092_p3 }
  0x87   : > { %5091 = sst [smem:[#allocation62_spill]] %s3979_s11  ;;  %s368_s12 = scalar_lea.vmem [#allocation10], %s2514_s23 }
  0x88   : > { %s5197_s17 = smov (!%p5093_p2, %s2774_s17), 0  ;;  %s3988_s0 = sshll.u32 %s368_s12, 4  ;;  %s378_s0 = int_to_ptr.vmem [resolvable:$true] %s3988_s0 }
  0x89   : > { %p5094_p0 = pmov %p5093_p2  ;;  %s369_s1 = sld [smem:[%s5195_s14 + %s5197_s17]] }
  0x8a   : > { %p164_p7 = scmp.ne.s32.totalorder %s3554_s30, %s3550_s29  ;;  %s5096_s4 = sld [smem:[#allocation67_spill]] }
  0x8b   : > { %p3994_p9 = pnand %p5094_p0, %p3941_p6  ;;  %p170_p10 = scmp.ne.s32.totalorder %s3550_s29, %s3546_s28 }
  0x8c   : > { %p5097_p12 = scmp.eq.s32.totalorder %s3594_s20, 0  ;;  %p5099_p4 = scmp.eq.s32.totalorder %s3780_s10, 0 }
  0x8d   : > { %p3212_p2 = pneg %p3994_p9 }
  0x8e   : > { %p4013_p6 = por %p164_p7, %p5097_p12  ;;  %p4019_p13 = por %p170_p10, %p5099_p4 }
  0x8f   : > { %s2717_s7 = sshll.u32 %s369_s1, 3 }
  0x90   : > { %s374_s19 = scalar_lea.hbm %s5096_s4, %s2717_s7  ;;  %s3215_s26 = scalar_lea.hbm %s5096_s4, 16 }
  0x91   : > { %s375_s25 = sshll.u32 %s374_s19, 4  ;;  %s376_s25 = int_to_ptr.hbm [resolvable:$true] %s375_s25 }
  0x92   : > { %s5100_s14 = scalar_select %p4019_p13, 1, 0 }
  0x93   : > { %s3208_s17 = sshra.s32 %s376_s25, 4  ;;  %s3209_s17 = int_to_ptr.hbm [resolvable:$true] %s3208_s17 }
  0x94   : > { %s3210_s1 = scalar_lea.hbm %s3209_s17, 8  ;;  %p3216_p7 = scmp.lt.s32.totalorder %s3209_s17, %s5096_s4 }
  0x95   : > { %p3211_p3 = scmp.ne.s32.totalorder %s3209_s17, %s3210_s1  ;;  %p3217_p10 = scmp.lt.s32.totalorder %s3215_s26, %s3210_s1 }
  0x97   : > { %p3213_p0 = pnand %p3212_p2, %p3211_p3  ;;  %p3218_p12 = por %p3217_p10, %p3216_p7 }
  0x99   : > { %p3214_p11 = pneg %p3213_p0 }
  0x9b   : > { %p3219_p4 = pnand %p3218_p12, %p3214_p11 }
  0x9d   : > { %3222 = shalt.err (!%p3219_p4)
}
  0x9e   : > { %2814 = dma.hbm_to_vmem [thread:$0]  (!%p3994_p9), %s376_s25, 128, %s378_s0, %s3954_s22, %s5087_s16, %s5087_s16, %s5086_s27  }
  0x9f   : > { %s154_s21 = ssub.s32 %s4000_s24, %s153_s6  ;;  %s389_s17 = sand.u32 1, %s3554_s30  }
  0xa0   : > { %p155_p11 = scmp.eq.s32.totalorder %s154_s21, 0  ;;  %s2759_s1 = smul.u32 192, %s389_s17 }
  0xa1   : > { %s2776_s28 = scalar_select %p4013_p6, [#allocation3], [#allocation20] }
  0xa2   : > { %s4044_s7 = scalar_select %p155_p11, %s3554_s30, %s157_s2  }
  0xa3   : > { %p5102_p3 = scmp.lt.s32.totalorder %s3594_s20, 4  ;;  %s391_s0 = scalar_lea.vmem [#allocation13], %s2759_s1 }
  0xa4   : > { %5101 = sst [smem:[#allocation63_spill]] %s4044_s7  ;;  %s4061_s24 = sshll.u32 %s391_s0, 4 }
  0xa5   : > { %p4050_p2 = pnand %p5102_p3, %p4013_p6  ;;  %p5104_p0 = pmov %p5102_p3 }
  0xa6   : > { %s2777_s23 = scalar_select %p4013_p6, %s3594_s20, 0 }
  0xa7   : > { %s5199_s28 = smov (!%p5104_p0, %s2776_s28), [#allocation26]  ;;  %p5105_p9 = pmov %p5104_p0 }
  0xa8   : > { %5106 = sst [smem:[#allocation59_spill]] %s4061_s24  ;;  %p2505_p7 = scmp.ge.s32.totalorder %s3594_s20, 1 }
  0xa9   : > { %s5201_s23 = smov (!%p5105_p9, %s2777_s23), 0  ;;  %p291_p10 = scmp.lt.s32.totalorder %s3594_s20, 5 }
  0xaa   : > { %s392_s6 = sld [smem:[%s5199_s28 + %s5201_s23]]  ;;  %s3600_s21 = smov [#allocation11]  }
  0xab   : > { %s5107_s5 = sld [smem:[#allocation68_spill]]  ;;  %p4069_p12 = pnand %p2505_p7, %p291_p10 }
  0xac   : > { %s304_s17 = sshll.u32 %s3600_s21, 4  ;;  %p5109_p4 = scmp.eq.s32.totalorder %s3780_s10, 0  ;;  %s305_s17 = int_to_ptr.vmem [resolvable:$true] %s304_s17 }
  0xad   : > { %p2795_p6 = pneg %p4069_p12  ;;  %s5111_s2 = sld [smem:[#allocation69_spill]] }
  0xae   : > { %p3242_p0 = pneg %p4050_p2 }
  0xaf   : > { %p4077_p11 = pnand %p2795_p6, %p5109_p4 }
  0xb0   : > { %s2760_s1 = smul.u32 192, %s392_s6 }
  0xb1   : > { %s302_s19 = sshll.u32 %s5107_s5, 4  ;;  %s303_s19 = int_to_ptr.hbm [resolvable:$true] %s302_s19 }
  0xb3   : > { %s397_s25 = scalar_lea.hbm %s5111_s2, %s2760_s1  ;;  %s3245_s5 = scalar_lea.hbm %s5111_s2, 768 }
  0xb4   : > { %s398_s24 = sshll.u32 %s397_s25, 4  ;;  %s399_s24 = int_to_ptr.hbm [resolvable:$true] %s398_s24 }
  0xb5   : > { %s3238_s3 = sshra.s32 %s399_s24, 4  ;;  %s3239_s3 = int_to_ptr.hbm [resolvable:$true] %s3238_s3 }
  0xb6   : > { %s3240_s4 = scalar_lea.hbm %s3239_s3, 192  ;;  %p3246_p10 = scmp.lt.s32.totalorder %s3239_s3, %s5111_s2 }
  0xb7   : > { %p3241_p3 = scmp.ne.s32.totalorder %s3239_s3, %s3240_s4  ;;  %p3247_p6 = scmp.lt.s32.totalorder %s3245_s5, %s3240_s4 }
  0xb9   : > { %p3243_p9 = pnand %p3242_p0, %p3241_p3  ;;  %p3248_p4 = por %p3247_p6, %p3246_p10 }
  0xbb   : > { %p3244_p7 = pneg %p3243_p9 }
  0xbd   : > { %p3249_p13 = pnand %p3248_p4, %p3244_p7 }
  0xbf   : > { %3252 = shalt.err (!%p3249_p13)
}
  0xc0   : > { %s5112_s1 = sld [smem:[#allocation59_spill]]  ;;  %p5117_p0 = scmp.eq.s32.totalorder %s3780_s10, 0 }
  0xc1   : > { %s5114_s0 = sld [smem:[#allocation45_spill]]  ;;  %p5123_p10 = scmp.lt.s32.totalorder %s3594_s20, 4 }
  0xc2   : > { %s5115_s25 = sld [smem:[#allocation46_spill]] }
  0xc3   : > { %s5116_s6 = sld [smem:[#allocation44_spill]]  ;;  %p5126_p4 = pmov %p5123_p10 }
  0xc4   : > { %2798 = dma.hbm_to_vmem [thread:$0]  (!%p4077_p11), %s303_s19, 128, %s305_s17, [#allocation12], %s5087_s16, %s5087_s16, %s5086_s27  }
  0xc5   : > { %s180_s3 = sld [smem:[#allocation3 + %s3594_s20]] }
  0xc6   : > { %s5113_s23 = int_to_ptr.vmem [resolvable:$true] %s5112_s1  ;;  %s181_s4 = sld [smem:[#allocation3 + %s3784_s8]] }
  0xc7   : > { %2819 = dma.hbm_to_vmem [thread:$0]  (!%p4050_p2), %s399_s24, 3072, %s5113_s23, %s3879_s18, %s5087_s16, %s5087_s16, %s5086_s27  }
  0xc8   : > { %p192_p13 = scmp.ne.s32.totalorder %s5115_s25, %s5114_s0  ;;  %s412_s5 = sand.u32 1, %s5115_s25  }
  0xc9   : > { %p198_p3 = scmp.ne.s32.totalorder %s5114_s0, %s5116_s6  ;;  %s185_s13 = sadd.s32 1, %s5115_s25 }
  0xca   : > { %p5119_p2 = scmp.eq.s32.totalorder %s3594_s20, 0  ;;  %s5120_s26 = sld [smem:[#allocation42_spill]] }
  0xcb   : > { %p4115_p9 = por %p198_p3, %p5117_p0  ;;  %s5121_s24 = sld [smem:[#allocation43_spill]] }
  0xcc   : > { %p194_p7 = por %p192_p13, %p5119_p2  ;;  %s5122_s19 = sld [smem:[#allocation41_spill]] }
  0xcd   : > { %s5118_s11 = scalar_select %p4115_p9, 1, 0 }
  0xce   : > { %s2518_s17 = sshll.u32 %s412_s5, 6  ;;  %s182_s28 = ssub.s32 %s180_s3, %s181_s4 }
  0xcf   : > { %p183_p11 = scmp.eq.s32.totalorder %s182_s28, 0  ;;  %p4123_p6 = pnand %p5123_p10, %p194_p7 }
  0xd0   : > { %s2779_s1 = scalar_select %p194_p7, [#allocation3], [#allocation21] }
  0xd1   : > { %s5203_s25 = smov (!%p183_p11, %s5115_s25), %s185_s13  ;;  %p5127_p13 = pmov %p5126_p4 }
  0xd2   : > { %5125 = sst [smem:[#allocation64_spill]] %s5203_s25  ;;  %s5205_s1 = smov (!%p5126_p4, %s2779_s1), [#allocation27] }
  0xd3   : > { %s2780_s23 = scalar_select %p194_p7, %s3594_s20, 0 }
  0xd4   : > { %s414_s6 = scalar_lea.vmem [#allocation14], %s2518_s17  ;;  %s4138_s4 = sld [smem:[#allocation3 + %s3594_s20]] }
  0xd5   : > { %s5207_s23 = smov (!%p5127_p13, %s2780_s23), 0  ;;  %s4135_s3 = sshll.u32 %s414_s6, 4  ;;  %s424_s3 = int_to_ptr.vmem [resolvable:$true] %s4135_s3 }
  0xd6   : > { %s415_s0 = sld [smem:[%s5205_s1 + %s5207_s23]]  ;;  %p220_p3 = scmp.ne.s32.totalorder %s5121_s24, %s5120_s26 }
  0xd7   : > { %s4141_s5 = sld [smem:[#allocation3 + %s3784_s8]]  ;;  %p226_p0 = scmp.ne.s32.totalorder %s5120_s26, %s5122_s19 }
  0xd8   : > { %s213_s13 = sadd.s32 1, %s5121_s24  ;;  %p5128_p2 = scmp.eq.s32.totalorder %s3780_s10, 0 }
  0xd9   : > { %s5131_s23 = sld [smem:[#allocation70_spill]]  ;;  %s435_s30 = sand.u32 1, %s5121_s24  }
  0xda   : > { %p4151_p7 = por %p226_p0, %p5128_p2  ;;  %p5133_p11 = scmp.eq.s32.totalorder %s3594_s20, 0 }
  0xdb   : > { %p3302_p13 = pneg %p4123_p6 }
  0xdc   : > { %s2718_s28 = sshll.u32 %s415_s0, 6  ;;  %p4161_p10 = por %p220_p3, %p5133_p11 }
  0xdd   : > { %s5129_s2 = scalar_select %p4151_p7, 1, 0 }
  0xde   : > { %s210_s26 = ssub.s32 %s4138_s4, %s4141_s5 }
  0xdf   : > { %5130 = sst [smem:[#allocation59_spill]] %s5129_s2  ;;  %s5132_s6 = smov %s5131_s23 }
  0xe0   : > { %s420_s7 = scalar_lea.hbm %s5131_s23, %s2718_s28  ;;  %s3305_s28 = scalar_lea.hbm %s5132_s6, 256 }
  0xe1   : > { %s421_s25 = sshll.u32 %s420_s7, 4  ;;  %s422_s25 = int_to_ptr.hbm [resolvable:$true] %s421_s25 }
  0xe2   : > { %s3298_s19 = sshra.s32 %s422_s25, 4  ;;  %s3299_s19 = int_to_ptr.hbm [resolvable:$true] %s3298_s19 }
  0xe3   : > { %s3300_s0 = scalar_lea.hbm %s3299_s19, 64  ;;  %p3306_p3 = scmp.lt.s32.totalorder %s3299_s19, %s5132_s6 }
  0xe4   : > { %p3301_p4 = scmp.ne.s32.totalorder %s3299_s19, %s3300_s0  ;;  %p3307_p11 = scmp.lt.s32.totalorder %s3305_s28, %s3300_s0 }
  0xe6   : > { %p3303_p0 = pnand %p3302_p13, %p3301_p4  ;;  %p3308_p7 = por %p3307_p11, %p3306_p3 }
  0xe8   : > { %p3304_p2 = pneg %p3303_p0 }
  0xea   : > { %p3309_p9 = pnand %p3308_p7, %p3304_p2 }
  0xec   : > { %3312 = shalt.err (!%p3309_p9)
}
  0xed   : > { %2824 = dma.hbm_to_vmem [thread:$0]  (!%p4123_p6), %s422_s25, 1024, %s424_s3, %s3954_s22, %s5087_s16, %s5087_s16, %s5086_s27  }
  0xee   : > { %p211_p4 = scmp.eq.s32.totalorder %s210_s26, 0  ;;  %s2761_s2 = smul.u32 3, %s435_s30 }
  0xef   : > { %s2782_s4 = scalar_select %p4161_p10, [#allocation3], [#allocation22] }
  0xf0   : > { %s5209_s24 = smov (!%p211_p4, %s5121_s24), %s213_s13  ;;  %p5135_p9 = scmp.lt.s32.totalorder %s3594_s20, 4 }
  0xf1   : > { %s2783_s21 = scalar_select %p4161_p10, %s3594_s20, 0 }
  0xf2   : > { %s5211_s4 = smov (!%p5135_p9, %s2782_s4), [#allocation28]  ;;  %p5136_p7 = pmov %p5135_p9 }
  0xf3   : > { %s437_s22 = scalar_lea.vmem [#allocation15], %s2761_s2  ;;  %s5139_s13 = sld [smem:[#allocation71_spill]] }
  0xf4   : > { %s5213_s21 = smov (!%p5136_p7, %s2783_s21), 0  ;;  %p5137_p13 = pmov %p5136_p7 }
  0xf5   : > { %s438_s16 = sld [smem:[%s5211_s4 + %s5213_s21]]  ;;  %s445_s30 = sshll.u32 %s437_s22, 4  ;;  %s446_s30 = int_to_ptr.vmem [resolvable:$true] %s445_s30 }
  0xf6   : > { %p4197_p0 = pnand %p5137_p13, %p4161_p10 }
  0xf8   : > { %p3332_p10 = pneg %p4197_p0 }
  0xf9   : > { %s5140_s7 = smov %s5139_s13 }
  0xfa   : > { %s3335_s28 = scalar_lea.hbm %s5140_s7, 12 }
  0xfb   : > { %s2762_s27 = smul.u32 3, %s438_s16 }
  0xfd   : > { %s442_s23 = scalar_lea.hbm %s5139_s13, %s2762_s27 }
  0xfe   : > { %s443_s26 = sshll.u32 %s442_s23, 4  ;;  %s444_s26 = int_to_ptr.hbm [resolvable:$true] %s443_s26 }
  0xff   : > { %s3328_s19 = sshra.s32 %s444_s26, 4  ;;  %s3329_s19 = int_to_ptr.hbm [resolvable:$true] %s3328_s19 }
 0x100   : > { %s3330_s8 = scalar_lea.hbm %s3329_s19, 3  ;;  %p3336_p11 = scmp.lt.s32.totalorder %s3329_s19, %s5140_s7 }
 0x101   : > { %p3331_p6 = scmp.ne.s32.totalorder %s3329_s19, %s3330_s8  ;;  %p3337_p4 = scmp.lt.s32.totalorder %s3335_s28, %s3330_s8 }
 0x103   : > { %p3333_p2 = pnand %p3332_p10, %p3331_p6  ;;  %p3338_p9 = por %p3337_p4, %p3336_p11 }
 0x105   : > { %p3334_p3 = pneg %p3333_p2 }
 0x107   : > { %p3339_p7 = pnand %p3338_p9, %p3334_p3 }
 0x109   : > { %3342 = shalt.err (!%p3339_p7)
}
 0x10a   : > { %s3601_s4 = smov 16   ;;  %s3602_s21 = smov 1  }
 0x10b   : > { %2829 = dma.hbm_to_vmem [thread:$0]  (!%p4197_p0), %s444_s26, 48, %s446_s30, %s3879_s18, %s3601_s4, %s3601_s4, %s3602_s21  }
 0x10c   : > { %465 = sbr.rel (%p4069_p12) target bundleno = 1550 (0x60e), region = 52  ;;  %s5141_s16 = sld [smem:[#allocation51_spill]] (!%p4069_p12) }
 0x10d   : > { %s467_s27 = sand.u32 (!%p4069_p12), 1, %s3780_s10  }
 0x10e   : > { %s4221_s13 = scalar_lea.sflag (!%p4069_p12), [#allocation6], %s467_s27 }
 0x112   : > { %s469_s25 = sand.u32 1, %s5141_s16  }
 0x113   : > { %s4219_s3 = sshll.u32 %s469_s25, 3 }
 0x114   : > { %s471_s23 = scalar_lea.vmem [#allocation5], %s4219_s3 }
 0x115   : > { %3477 = dma.done.wait (%p3804_p5), %s4221_s13, 128  }
 0x116   : > { %3479 = vsyncadd (%p3804_p5), %s4221_s13, 4294967168  ;;  %s479_s18 = sand.u32 1, %s3574_s15   ;;  %s478_s5 = scalar_lea.sflag [#allocation9], %s467_s27 }
 0x117   : > { %s4231_s12 = sshll.u32 %s479_s18, 3 }
 0x118   : > { %s481_s30 = scalar_lea.vmem [#allocation8], %s4231_s12 }
 0x119   : > { %3481 = dma.done.wait (%p3873_p8), %s478_s5, 128  }
 0x11a   : > { %3483 = vsyncadd (%p3873_p8), %s478_s5, 4294967168  ;;  %s5143_s26 = sld [smem:[#allocation48_spill]] }
 0x120   : > { %s489_s8 = sand.u32 1, %s5143_s26  }
 0x121   : > { %s4239_s0 = sshll.u32 %s489_s8, 3 }
 0x122   : > { %s491_s17 = scalar_lea.vmem [#allocation10], %s4239_s0 }
 0x123   : > { %3485 = dma.done.wait (%p3947_p1), %s478_s5, 128  }
 0x124   : > { %3487 = vsyncadd (%p3947_p1), %s478_s5, 4294967168  ;;  %p5145_p5 = scmp.eq.s32.totalorder %s3780_s10, 0 }
 0x126   : > { %3489 = dma.done.wait (%p5145_p5), [#allocation12], 128   ;;  %p5146_p12 = pmov %p5145_p5 }
 0x127   : > { %s504_s9 = sand.u32 1, %s3550_s29   ;;  %p5147_p8 = scmp.ne.s32.totalorder %s5100_s14, 0 }
 0x128   : > { %3491 = vsyncadd (%p5146_p12), [#allocation12], 4294967168  ;;  %s2763_s28 = smul.u32 192, %s504_s9 }
 0x12a   : > { %s4251_s1 = scalar_lea.vmem [#allocation13], %s2763_s28 }
 0x12b   : > { %3493 = dma.done.wait (%p5147_p8), %s4221_s13, 3072  }
 0x12c   : > { %3495 = vsyncadd (%p5147_p8), %s4221_s13, 4294964224  ;;  %s5148_s2 = sld [smem:[#allocation45_spill]]  ;;  %p5149_p1 = scmp.ne.s32.totalorder %s5118_s11, 0 }
 0x132   : > { %s514_s4 = sand.u32 1, %s5148_s2  }
 0x133   : > { %s2526_s21 = sshll.u32 %s514_s4, 6 }
 0x134   : > { %s4260_s16 = scalar_lea.vmem [#allocation14], %s2526_s21 }
 0x135   : > { %3497 = dma.done.wait (%p5149_p1), %s478_s5, 1024  }
 0x136   : > { %3499 = vsyncadd (%p5149_p1), %s478_s5, 4294966272  ;;  %s5150_s22 = sld [smem:[#allocation42_spill]] }
 0x137   : > { %s5151_s27 = sld [smem:[#allocation59_spill]] }
 0x13c   : > { %s524_s25 = sand.u32 1, %s5150_s22  }
 0x13d   : > { %s2764_s18 = smul.u32 3, %s524_s25  ;;  %p5152_p13 = scmp.ne.s32.totalorder %s5151_s27, 0 }
 0x13f   : > { %s4267_s26 = scalar_lea.vmem [#allocation15], %s2764_s18 }
 0x140   : > { %3501 = dma.done.wait (%p5152_p13), %s4221_s13, 48  }
 0x141   : > { %3503 = vsyncadd (%p5152_p13), %s4221_s13, 4294967248  ;;  %v2729_v0 = vld [vmem:[%s4251_s1 + $0x38] sm:$0xff]  ;;  %v2728_v2 = vld [vmem:[%s4251_s1 + $0x30] sm:$0xff]  ;;  %s3603_s14 = smov 32   ;;  %s3604_s11 = smov 96   ;;  %vm919_vm0 = vcmask 1047556  }
 0x142   : > { %v2737_v1 = vld [vmem:[%s4251_s1 + $0x78] sm:$0xff]  ;;  %740 = vmatpush.bf16.msra.mxu0 %v2729_v0  ;;  %v2736_v3 = vld [vmem:[%s4251_s1 + $0x70] sm:$0xff]  ;;  %v2727_v4 = vld [vmem:[%s4251_s1 + $0x28] sm:$0xff]  ;;  %s3605_s3 = smov 64   ;;  %v3606_v35 = vmov 1983009808  }
 0x143   : > { %811 = vmatpush.bf16.msra.mxu1 %v2737_v1  ;;  %v2735_v5 = vld [vmem:[%s4251_s1 + $0x68] sm:$0xff]  ;;  %v2726_v6 = vld [vmem:[%s4251_s1 + $0x20] sm:$0xff]  ;;  %v2725_v8 = vld [vmem:[%s4251_s1 + $0x18] sm:$0xff]  ;;  %v924_v36 = vunpack.c.l.s4 %v3606_v35  ;;  %v3607_v54 = vmov 1934713408   ;;  %vm1653_vm1 = vcmask 261120  }
 0x144   : > { %v2734_v7 = vld [vmem:[%s4251_s1 + $0x60] sm:$0xff]  ;;  %v2733_v9 = vld [vmem:[%s4251_s1 + $0x58] sm:$0xff]  ;;  %v2724_v10 = vld [vmem:[%s4251_s1 + $0x10] sm:$0xff]  ;;  %v948_v55 = vunpack.c.l.s4 %v3607_v54  ;;  %vm1764_vm2 = vcmask 130048   ;;  %s595_s13 = sld [smem:[#allocation3 + %s3780_s10]]  ;;  %vm2219_vm3 = vcmask 523264  }
 0x145   : > { %v2732_v11 = vld [vmem:[%s4251_s1 + $0x50] sm:$0xff]  ;;  %v2723_v12 = vld [vmem:[%s4251_s1 + $0x8] sm:$0xff]  ;;  %v2722_v14 = vld [vmem:[%s4251_s1] sm:$0xff]  ;;  %v4309_v40 = vunpack.c.0.s8 %v924_v36  ;;  %s5153_s5 = sld [smem:[#allocation72_spill]]  ;;  %vm2222_vm4 = vcmask 785408   ;;  %s2754_s28 = sshll.u32 %s3780_s10, 4 }
 0x146   : > { %741 = vmatpush.bf16.msra.mxu0 %v2728_v2  ;;  %v2731_v13 = vld [vmem:[%s4251_s1 + $0x48] sm:$0xff]  ;;  %v2730_v15 = vld [vmem:[%s4251_s1 + $0x40] sm:$0xff]  ;;  %s5154_s19 = sld [smem:[#allocation39_spill]] }
 0x147   : > { %812 = vmatpush.bf16.msra.mxu1 %v2736_v3  ;;  %v2719_v16 = vld [vmem:[%s471_s23] sm:$0xff]  ;;  %v2720_v17 = vld [vmem:[%s481_s30] sm:$0xff] }
 0x148   : > { %v3088_v20 = vld [vmem:[%s4267_s26] ss:$0 sm:$0xff]  ;;  %v3089_v22 = vld [vmem:[%s4267_s26 + $0x1] ss:$0 sm:$0xff] }
 0x14a   : > { %742 = vmatpush.bf16.msra.mxu0 %v2727_v4  ;;  %p596_p0 = scmp.lt.s32.totalorder %s595_s13, 3 }
 0x14b   : > { %813 = vmatpush.bf16.msra.mxu1 %v2735_v5 }
 0x14c   : > { %s5215_s13 = smov (!%p596_p0, %s595_s13), 3  ;;  %s586_s8 = sand.u32 1, %s5154_s19  }
 0x14d   : > { %s598_s30 = scalar_lea.vmem %s5153_s5, %s5215_s13  ;;  %s2527_s0 = sshll.u32 %s586_s8, 4 }
 0x14e   : > { %743 = vmatpush.bf16.msra.mxu0 %v2726_v6  ;;  %s588_s2 = scalar_lea.vmem [#allocation16], %s2527_s0  ;;  %s2294_s18 = scalar_lea.sflag [#allocation7], %s586_s8 }
 0x14f   : > { %814 = vmatpush.bf16.msra.mxu1 %v2734_v7  ;;  %s2306_s27 = sshll.u32 %s588_s2, 4  ;;  %s2307_s27 = int_to_ptr.vmem [resolvable:$true] %s2306_s27 }
 0x152   : > { %744 = vmatpush.bf16.msra.mxu0 %v2725_v8 }
 0x153   : > { %815 = vmatpush.bf16.msra.mxu1 %v2733_v9  ;;  %v4339_v9 = vunpack.c.0.s8 %v948_v55 }
 0x156   : > { %745 = vmatpush.bf16.msra.mxu0 %v2724_v10 }
 0x157   : > { %816 = vmatpush.bf16.msra.mxu1 %v2732_v11 }
 0x15a   : > { %746 = vmatpush.bf16.msra.mxu0 %v2723_v12 }
 0x15b   : > { %817 = vmatpush.bf16.msra.mxu1 %v2731_v13 }
 0x15e   : > { %747 = vmatpush.bf16.msra.mxu0 %v2722_v14 }
 0x15f   : > { %818 = vmatpush.bf16.msra.mxu1 %v2730_v15 }
 0x161   : > { %748 = vmatmul.bf16.vlgmr.msra.gmra.mxu0 %v2719_v16 }
 0x162   : > { %819 = vmatmul.bf16.vlgmr.msra.gmra.mxu1 %v2720_v17 }
 0x1de   : > { %v749_v18 = vpop.f32.mrf.mxu0 }
 0x1df   : > { %v820_v19 = vpop.f32.mrf.mxu1  ;;  %v750_v21 = vadd.f32 %v3088_v20, %v749_v18 }
 0x1e0   : > { %v4297_v26 = vadd.f32 %v3089_v22, %v820_v19 }
 0x1e1   : > { %v896_v25 = vmul.f32 0.17677669, %v750_v21 }
 0x1e2   : > { %v1169_v11 = vrot.slane %v4297_v26, 4 }
 0x1e3   : > { %v921_v41 = vrot.slane %v896_v25, 4 }
 0x1e6   : > { %v751_v23 = vpop.f32.mrf.mxu0 }
 0x1e7   : > { %v822_v24 = vpop.f32.mrf.mxu1  ;;  %v752_v27 = vadd.f32 %v3088_v20, %v751_v23 }
 0x1e8   : > { %v4299_v28 = vadd.f32 %v3089_v22, %v822_v24 }
 0x1e9   : > { %v897_v29 = vmul.f32 0.17677669, %v752_v27 }
 0x1ea   : > { %v3038_v30 = vpack.i.bf16 %v4299_v28, %v4297_v26  ;;  %v1225_v10 = vrot.slane %v4299_v28, 4 }
 0x1eb   : > { %v3048_v31 = vpack.i.bf16 %v897_v29, %v896_v25  ;;  %v977_v39 = vrot.slane %v897_v29, 4 }
 0x1ec   : > { %3039 = vrot.lane.b32.xlu1 %v3038_v30, %s3603_s14  ;;  %3029 = vrot.lane.b32.xlu0 %v3038_v30, %s3604_s11 }
 0x1ed   : > { %3049 = vrot.lane.b32.xlu2 %v3048_v31, %s3605_s3 }
 0x1f4   : > { %3034 = vrot.lane.b32.xlu0 %v3038_v30, %s3605_s3  ;;  %3044 = vrot.lane.b32.xlu1 %v3048_v31, %s3604_s11 }
 0x1f5   : > { %3054 = vrot.lane.b32.xlu2 %v3048_v31, %s3603_s14 }
 0x247   : > { %v3050_v32 = vpop.permute.xlu2 %3049 }
 0x248   : > { %v3052_v33 = vunpack.i.h.bf16 %v3050_v32  ;;  %v3051_v34 = vunpack.i.l.bf16 %v3050_v32 }
 0x24a   : > { %v975_v37 = vrot.slane %v3052_v33, 4  ;;  %v918_v38 = vrot.slane %v3051_v34, 4  ;;  %v978_v42 = vsel %vm919_vm0, %v3052_v33, %v977_v39  ;;  %v922_v45 = vsel %vm919_vm0, %v3051_v34, %v921_v41 }
 0x24b   : > { %v4318_v53 = vperm.slane %v978_v42, %v4309_v40  ;;  %v4327_v62 = vperm.slane %v922_v45, %v4309_v40 }
 0x24c   : > { %v976_v43 = vsel %vm919_vm0, %v975_v37, %v897_v29  ;;  %v920_v44 = vsel %vm919_vm0, %v918_v38, %v896_v25 }
 0x24d   : > { %v4321_v60 = vperm.slane %v976_v43, %v4309_v40  ;;  %v4324_v61 = vperm.slane %v920_v44, %v4309_v40  ;;  %v1013_v8 = vrot.slane %v4318_v53, 4  ;;  %v957_v14 = vrot.slane %v4327_v62, 4 }
 0x24f   : > { %v4315_v48 = vpop.permute.xlu2 %3054  ;;  %v1001_v12 = vrot.slane %v4321_v60, 4  ;;  %v945_v13 = vrot.slane %v4324_v61, 4 }
 0x250   : > { %v3057_v63 = vunpack.i.h.bf16 %v4315_v48  ;;  %v3056_v4 = vunpack.i.l.bf16 %v4315_v48 }
 0x252   : > { %v987_v18 = vrot.slane %v3057_v63, 4  ;;  %v931_v22 = vrot.slane %v3056_v4, 4 }
 0x25e   : > { %v3040_v46 = vpop.permute.xlu1 %3039  ;;  %v3030_v47 = vpop.permute.xlu0 %3029 }
 0x25f   : > { %v3042_v49 = vunpack.i.h.bf16 %v3040_v46  ;;  %v3041_v50 = vunpack.i.l.bf16 %v3040_v46  ;;  %v3032_v51 = vunpack.i.h.bf16 %v3030_v47  ;;  %v3031_v52 = vunpack.i.l.bf16 %v3030_v47 }
 0x261   : > { %v1235_v56 = vrot.slane %v3042_v49, 4  ;;  %v1179_v57 = vrot.slane %v3041_v50, 4  ;;  %v1237_v58 = vrot.slane %v3032_v51, 4  ;;  %v1181_v59 = vrot.slane %v3031_v52, 4 }
 0x263   : > { %v1236_v0 = vsel %vm919_vm0, %v1235_v56, %v3032_v51  ;;  %v1238_v1 = vsel %vm919_vm0, %v3042_v49, %v1237_v58  ;;  %v1180_v2 = vsel %vm919_vm0, %v1179_v57, %v3031_v52  ;;  %v1182_v3 = vsel %vm919_vm0, %v3041_v50, %v1181_v59 }
 0x264   : > { %v1242_v5 = vperm.slane %v1236_v0, %v4309_v40  ;;  %v1246_v6 = vperm.slane %v1238_v1, %v4309_v40  ;;  %v1186_v7 = vperm.slane %v1180_v2, %v4309_v40  ;;  %v1190_v15 = vperm.slane %v1182_v3, %v4309_v40 }
 0x266   : > { %v3035_v16 = vpop.permute.xlu0 %3034  ;;  %v4347_v17 = vpop.permute.xlu1 %3044  ;;  %v1247_v23 = vrot.slane %v1242_v5, 4  ;;  %v1259_v24 = vrot.slane %v1246_v6, 4  ;;  %v1191_v25 = vrot.slane %v1186_v7, 4  ;;  %v1203_v32 = vrot.slane %v1190_v15, 4 }
 0x267   : > { %v3037_v19 = vunpack.i.h.bf16 %v3035_v16  ;;  %v3036_v20 = vunpack.i.l.bf16 %v3035_v16  ;;  %v3047_v21 = vunpack.i.h.bf16 %v4347_v17  ;;  %v3046_v39 = vunpack.i.l.bf16 %v4347_v17 }
 0x269   : > { %v1223_v27 = vrot.slane %v3037_v19, 4  ;;  %v1226_v29 = vsel %vm919_vm0, %v3037_v19, %v1225_v10  ;;  %v1167_v30 = vrot.slane %v3036_v20, 4  ;;  %v1170_v31 = vsel %vm919_vm0, %v3036_v20, %v1169_v11 }
 0x26a   : > { %v1234_v33 = vperm.slane %v1226_v29, %v4309_v40  ;;  %v1178_v34 = vperm.slane %v1170_v31, %v4309_v40  ;;  %v988_v35 = vsel %vm919_vm0, %v987_v18, %v3047_v21  ;;  %v989_v38 = vrot.slane %v3047_v21, 4 }
 0x26b   : > { %v1224_v36 = vsel %vm919_vm0, %v1223_v27, %v4299_v28  ;;  %v1168_v37 = vsel %vm919_vm0, %v1167_v30, %v4297_v26  ;;  %v994_v28 = vperm.slane %v988_v35, %v4309_v40  ;;  %v932_v18 = vsel %vm919_vm0, %v931_v22, %v3046_v39 }
 0x26c   : > { %v1230_v41 = vperm.slane %v1224_v36, %v4309_v40  ;;  %v1261_v42 = vrot.slane %v1234_v33, 4  ;;  %v1174_v43 = vperm.slane %v1168_v37, %v4309_v40  ;;  %v1204_v44 = vsel %vm919_vm0, %v1203_v32, %v1178_v34 }
 0x26d   : > { %v1205_v45 = vrot.slane %v1178_v34, 4  ;;  %v1210_v46 = vperm.slane %v1204_v44, %v4339_v9  ;;  %v1260_v47 = vsel %vm919_vm0, %v1259_v24, %v1234_v33  ;;  %v990_v10 = vsel %vm919_vm0, %v3057_v63, %v989_v38 }
 0x26e   : > { %v1249_v49 = vrot.slane %v1230_v41, 4  ;;  %v1192_v26 = vsel %vm919_vm0, %v1191_v25, %v1174_v43  ;;  %v1193_v50 = vrot.slane %v1174_v43, 4  ;;  %v1248_v51 = vsel %vm919_vm0, %v1247_v23, %v1230_v41 }
 0x26f   : > { %v1198_v52 = vperm.slane %v1192_v26, %v4339_v9  ;;  %v1206_v54 = vsel %vm919_vm0, %v1190_v15, %v1205_v45  ;;  %v1219_v55 = vrot.slane %v1210_v46, 4  ;;  %v4375_v56 = vperm.slane %v1248_v51, %v4339_v9 }
 0x270   : > { %v1194_v57 = vsel %vm919_vm0, %v1186_v7, %v1193_v50  ;;  %v1214_v58 = vperm.slane %v1206_v54, %v4339_v9  ;;  %v1250_v59 = vsel %vm919_vm0, %v1242_v5, %v1249_v49  ;;  %v1262_v0 = vsel %vm919_vm0, %v1246_v6, %v1261_v42 }
 0x271   : > { %v1202_v1 = vperm.slane %v1194_v57, %v4339_v9  ;;  %v1215_v2 = vrot.slane %v1198_v52, 4  ;;  %v1258_v3 = vperm.slane %v1250_v59, %v4339_v9  ;;  %v1266_v15 = vperm.slane %v1260_v47, %v4339_v9 }
 0x272   : > { %v1221_v11 = vrot.slane %v1214_v58, 4  ;;  %v1270_v7 = vperm.slane %v1262_v0, %v4339_v9  ;;  %v1271_v16 = vrot.slane %v4375_v56, 4  ;;  %v1220_v5 = vsel %vm919_vm0, 0.0, %v1219_v55 }
 0x273   : > { %v1217_v17 = vrot.slane %v1202_v1, 4  ;;  %v4390_v6 = vrot.slane %v1258_v3, 4  ;;  %v1275_v20 = vrot.slane %v1266_v15, 4  ;;  %v998_v63 = vperm.slane %v990_v10, %v4309_v40 }
 0x274   : > { %v1222_v19 = vsel %vm919_vm0, 0.0, %v1221_v11  ;;  %v1277_v21 = vrot.slane %v1270_v7, 4  ;;  %v1216_v23 = vsel %vm919_vm0, 0.0, %v1215_v2  ;;  %v4402_v29 = vsel %vm919_vm0, 0.0, %v1271_v16 }
 0x275   : > { %v1218_v24 = vsel %vm919_vm0, 0.0, %v1217_v17  ;;  %v4399_v25 = vsel %vm919_vm0, 0.0, %v4390_v6  ;;  %v1295_v27 = vrot.slane %v1222_v19, 4  ;;  %v1276_v22 = vsel %vm919_vm0, 0.0, %v1275_v20 }
 0x276   : > { %v1278_v30 = vsel %vm919_vm0, 0.0, %v1277_v21  ;;  %v1290_v31 = vsel %vm919_vm0, %v1221_v11, %v1210_v46  ;;  %v1284_v32 = vrot.slane %v1218_v24, 4  ;;  %v1338_v34 = vrot.slane %v4399_v25, 4 }
 0x277   : > { %v1296_v33 = vsel %vm919_vm0, %v1295_v27, %v1220_v5  ;;  %v999_v35 = vrot.slane %v994_v28, 4  ;;  %v1002_v36 = vsel %vm919_vm0, %v994_v28, %v1001_v12  ;;  %v1011_v37 = vrot.slane %v998_v63, 4 }
 0x278   : > { %v1014_v38 = vsel %vm919_vm0, %v998_v63, %v1013_v8  ;;  %v933_v41 = vrot.slane %v3046_v39, 4  ;;  %v1349_v42 = vrot.slane %v1278_v30, 4  ;;  %v1010_v44 = vperm.slane %v1002_v36, %v4339_v9 }
 0x279   : > { %v1000_v43 = vsel %vm919_vm0, %v999_v35, %v4321_v60  ;;  %v1022_v45 = vperm.slane %v1014_v38, %v4339_v9  ;;  %v1012_v12 = vsel %vm919_vm0, %v1011_v37, %v4318_v53  ;;  %v938_v8 = vperm.slane %v932_v18, %v4309_v40 }
 0x27a   : > { %v4420_v46 = vperm.slane %v1000_v43, %v4339_v9  ;;  %v934_v47 = vsel %vm919_vm0, %v3056_v4, %v933_v41  ;;  %v4429_v39 = vperm.slane %v1012_v12, %v4339_v9  ;;  %v4431_v60 = vrot.slane %v1010_v44, 4 }
 0x27b   : > { %v4433_v28 = vrot.slane %v1022_v45, 4  ;;  %v942_v49 = vperm.slane %v934_v47, %v4309_v40  ;;  %v1344_v26 = vsel %vm919_vm0, %v1277_v21, %v1266_v15  ;;  %v943_v53 = vrot.slane %v938_v8, 4 }
 0x27c   : > { %v1023_v50 = vrot.slane %v4420_v46, 4  ;;  %v946_v48 = vsel %vm919_vm0, %v938_v8, %v945_v13  ;;  %v1350_v4 = vsel %vm919_vm0, %v1349_v42, %v1276_v22  ;;  %v4444_v51 = vsel %vm919_vm0, 0.0, %v4431_v60 }
 0x27d   : > { %v954_v54 = vperm.slane %v946_v48, %v4339_v9  ;;  %v1279_v55 = vsel %vm919_vm0, %v1217_v17, %v1198_v52  ;;  %v1027_v58 = vrot.slane %v4429_v39, 4  ;;  %v4454_v59 = vsel %vm919_vm0, 0.0, %v4433_v28 }
 0x27e   : > { %v4449_v57 = vsel %vm919_vm0, 0.0, %v1023_v50  ;;  %v944_v13 = vsel %vm919_vm0, %v943_v53, %v4324_v61  ;;  %v1090_v0 = vrot.slane %v4444_v51, 4  ;;  %v955_v2 = vrot.slane %v942_v49, 4 }
 0x27f   : > { %v4460_v1 = vperm.slane %v944_v13, %v4339_v9  ;;  %v958_v52 = vsel %vm919_vm0, %v942_v49, %v957_v14  ;;  %v4466_v10 = vrot.slane %v954_v54, 4  ;;  %v1283_v11 = vperm.slane %v1279_v55, %v4309_v40  ;;  %v2745_v55 = vld [vmem:[%s4251_s1 + $0xb8] sm:$0xff] }
 0x280   : > { %v966_v3 = vperm.slane %v958_v52, %v4339_v9  ;;  %v1285_v15 = vsel %vm919_vm0, %v1284_v32, %v1216_v23  ;;  %v1101_v61 = vrot.slane %v4454_v59, 4  ;;  %v956_v7 = vsel %vm919_vm0, %v955_v2, %v4327_v62  ;;  %882 = vmatpush.bf16.msra.mxu2 %v2745_v55 }
 0x281   : > { %v967_v16 = vrot.slane %v4460_v1, 4  ;;  %v1289_v17 = vperm.slane %v1285_v15, %v4309_v40  ;;  %v4476_v5 = vperm.slane %v956_v7, %v4339_v9  ;;  %v4480_v14 = vsel %vm919_vm0, 0.0, %v4466_v10 }
 0x282   : > { %v4482_v18 = vrot.slane %v966_v3, 4  ;;  %v1300_v19 = vperm.slane %v1296_v33, %v4309_v40  ;;  %v4486_v20 = vsel %vm919_vm0, 0.0, %v1027_v58  ;;  %v1294_v21 = vperm.slane %v1290_v31, %v4309_v40 }
 0x283   : > { %v4489_v62 = vsel %vm919_vm0, 0.0, %v967_v16  ;;  %v1301_v63 = vrot.slane %v1289_v17, 4  ;;  %v1036_v23 = vrot.slane %v4480_v14, 4  ;;  %v1303_v24 = vrot.slane %v1283_v11, 4  ;;  %v2744_v16 = vld [vmem:[%s4251_s1 + $0xb0] sm:$0xff] }
 0x284   : > { %v1313_v25 = vrot.slane %v1300_v19, 4  ;;  %v1333_v27 = vsel %vm919_vm0, %v4390_v6, %v4375_v56  ;;  %v4498_v22 = vsel %vm919_vm0, 0.0, %v4482_v18  ;;  %v1339_v31 = vsel %vm919_vm0, %v1338_v34, %v4402_v29  ;;  %883 = vmatpush.bf16.msra.mxu2 %v2744_v16 }
 0x285   : > { %v1302_v30 = vsel %vm919_vm0, %v1301_v63, %v1283_v11  ;;  %v1337_v32 = vperm.slane %v1333_v27, %v4309_v40  ;;  %v971_v33 = vrot.slane %v4476_v5, 4  ;;  %v1343_v37 = vperm.slane %v1339_v31, %v4309_v40 }
 0x286   : > { %v1308_v35 = vperm.slane %v1302_v30, %v4339_v9  ;;  %v1314_v36 = vsel %vm919_vm0, %v1313_v25, %v1294_v21  ;;  %v1348_v6 = vperm.slane %v1344_v26, %v4309_v40  ;;  %v1354_v38 = vperm.slane %v1350_v4, %v4309_v40 }
 0x287   : > { %v1320_v56 = vperm.slane %v1314_v36, %v4339_v9  ;;  %v1357_v41 = vrot.slane %v1337_v32, 4  ;;  %v1047_v42 = vrot.slane %v4498_v22, 4  ;;  %v1355_v43 = vrot.slane %v1343_v37, 4 }
 0x288   : > { %v1304_v29 = vsel %vm919_vm0, %v1289_v17, %v1303_v24  ;;  %v1315_v34 = vrot.slane %v1294_v21, 4  ;;  %v1367_v45 = vrot.slane %v1354_v38, 4  ;;  %v1369_v50 = vrot.slane %v1348_v6, 4 }
 0x289   : > { %v1325_v44 = vrot.slane %v1320_v56, 4  ;;  %v4514_v12 = vperm.slane %v1304_v29, %v4339_v9  ;;  %v1358_v47 = vsel %vm919_vm0, %v1343_v37, %v1357_v41  ;;  %v1356_v8 = vsel %vm919_vm0, %v1355_v43, %v1337_v32 }
 0x28a   : > { %v1316_v49 = vsel %vm919_vm0, %v1300_v19, %v1315_v34  ;;  %v4520_v26 = vperm.slane %v1358_v47, %v4339_v9  ;;  %v1362_v48 = vperm.slane %v1356_v8, %v4339_v9  ;;  %v1368_v4 = vsel %vm919_vm0, %v1367_v45, %v1348_v6  ;;  %v2743_v6 = vld [vmem:[%s4251_s1 + $0xa8] sm:$0xff] }
 0x28b   : > { %v1326_v53 = vsel %vm919_vm0, %v1325_v44, %v1308_v35  ;;  %v4526_v54 = vperm.slane %v1316_v49, %v4339_v9  ;;  %v1374_v58 = vperm.slane %v1368_v4, %v4339_v9  ;;  %v1331_v2 = vrot.slane %v4514_v12, 4  ;;  %884 = vmatpush.bf16.msra.mxu2 %v2743_v6 }
 0x28c   : > { %v1387_v13 = vpack.c.bf16 %v1326_v53, %v1326_v53  ;;  %v1370_v52 = vsel %vm919_vm0, %v1354_v38, %v1369_v50  ;;  %v972_v3 = vsel %vm919_vm0, 0.0, %v971_v33  ;;  %v1385_v15 = vrot.slane %v4520_v26, 4 }
 0x28d   : > { %v4534_v11 = vperm.slane %v1370_v52, %v4339_v9  ;;  %v1327_v7 = vrot.slane %v1308_v35, 4  ;;  %v1379_v17 = vrot.slane %v1374_v58, 4  ;;  %v1332_v19 = vsel %vm919_vm0, %v4526_v54, %v1331_v2 }
 0x28e   : > { %v1381_v21 = vrot.slane %v1362_v48, 4  ;;  %v1650_v63 = vunpack.c.l.b16 %v1387_v13  ;;  %v1393_v25 = vpack.c.bf16 %v1332_v19, %v1332_v19  ;;  %v1031_v37 = vsel %vm919_vm0, %v4466_v10, %v4460_v1 }
 0x28f   : > { %v1386_v24 = vsel %vm919_vm0, %v4534_v11, %v1385_v15  ;;  %v1328_v27 = vsel %vm919_vm0, %v1320_v56, %v1327_v7  ;;  %v1380_v22 = vsel %vm919_vm0, %v1379_v17, %v1362_v48  ;;  %v1035_v43 = vperm.slane %v1031_v37, %v4309_v40 }
 0x290   : > { %v1394_v30 = vpack.c.bf16 %v1386_v24, %v1386_v24  ;;  %v1382_v32 = vsel %vm919_vm0, %v1374_v58, %v1381_v21  ;;  %v1389_v31 = vpack.c.bf16 %v1328_v27, %v1328_v27  ;;  %v1388_v33 = vpack.c.bf16 %v1380_v22, %v1380_v22 }
 0x291   : > { %v1741_v35 = vunpack.c.l.b16 %v1393_v25  ;;  %v1390_v36 = vpack.c.bf16 %v1382_v32, %v1382_v32  ;;  %v1037_v56 = vsel %vm919_vm0, %v1036_v23, %v4489_v62  ;;  %v1042_v45 = vsel %vm919_vm0, %v4482_v18, %v4476_v5 }
 0x292   : > { %v1742_v38 = vunpack.c.l.b16 %v1394_v30  ;;  %v1681_v41 = vunpack.c.l.b16 %v1389_v31  ;;  %v1651_v29 = vunpack.c.l.b16 %v1388_v33  ;;  %v1041_v44 = vperm.slane %v1037_v56, %v4309_v40 }
 0x293   : > { %v1682_v34 = vunpack.c.l.b16 %v1390_v36  ;;  %v1046_v10 = vperm.slane %v1042_v45, %v4309_v40  ;;  %v1048_v47 = vsel %vm919_vm0, %v1047_v42, %v972_v3  ;;  %v1055_v8 = vrot.slane %v1035_v43, 4  ;;  %v2742_v3 = vld [vmem:[%s4251_s1 + $0xa0] sm:$0xff] }
 0x294   : > { %v1743_v1 = vpack.c.b16 %v1742_v38, %v1741_v35  ;;  %v1652_v49 = vpack.c.b16 %v1651_v29, %v1650_v63  ;;  %v1052_v14 = vperm.slane %v1048_v47, %v4309_v40  ;;  %v1053_v53 = vrot.slane %v1041_v44, 4  ;;  %885 = vmatpush.bf16.msra.mxu2 %v2742_v3  ;;  %v2740_v38 = vld [vmem:[%s4251_s1 + $0x90] sm:$0xff] }
 0x295   : > { %v1683_v50 = vpack.c.b16 %v1682_v34, %v1681_v41  ;;  %v1085_v23 = vsel %vm919_vm0, %v4431_v60, %v4420_v46  ;;  %v1091_v5 = vsel %vm919_vm0, %v1090_v0, %v4449_v57  ;;  %v1096_v18 = vsel %vm919_vm0, %v4433_v28, %v4429_v39 }
 0x296   : > { %v1748_v62 = vsel %vm1653_vm1, %v1743_v1, 0  ;;  %v1658_v42 = vsel %vm1653_vm1, %v1652_v49, 0  ;;  %v1065_v4 = vrot.slane %v1052_v14, 4  ;;  %v1054_v55 = vsel %vm919_vm0, %v1053_v53, %v1035_v43 }
 0x297   : > { %1757 = vmatpush.bf16.xpose.msrb.mxu0 %v1748_v62  ;;  %v1688_v48 = vsel %vm1653_vm1, %v1683_v50, 0  ;;  %1667 = vmatpush.bf16.xpose.msra.mxu3 %v1658_v42  ;;  %v1089_v46 = vperm.slane %v1085_v23, %v4309_v40  ;;  %v1095_v60 = vperm.slane %v1091_v5, %v4309_v40  ;;  %v1100_v51 = vperm.slane %v1096_v18, %v4309_v40  ;;  %v2739_v50 = vld [vmem:[%s4251_s1 + $0x88] sm:$0xff] }
 0x298   : > { %v1066_v57 = vsel %vm919_vm0, %v1065_v4, %v1046_v10  ;;  %v1102_v39 = vsel %vm919_vm0, %v1101_v61, %v4486_v20  ;;  %v1056_v28 = vsel %vm919_vm0, %v1041_v44, %v1055_v8  ;;  %v1067_v0 = vrot.slane %v1046_v10, 4  ;;  %v2721_v4 = vld [vmem:[%s491_s17] sm:$0xff] }
 0x299   : > { %v1329_v58 = vrot.slane %v4526_v54, 4  ;;  %v1072_v13 = vperm.slane %v1066_v57, %v4339_v9  ;;  %v1106_v2 = vperm.slane %v1102_v39, %v4309_v40  ;;  %v1107_v52 = vrot.slane %v1095_v60, 4  ;;  %v2741_v54 = vld [vmem:[%s4251_s1 + $0x98] sm:$0xff] }
 0x29a   : > { %v1109_v15 = vrot.slane %v1089_v46, 4  ;;  %v4589_v7 = vperm.slane %v1056_v28, %v4339_v9  ;;  %v1068_v59 = vsel %vm919_vm0, %v1052_v14, %v1067_v0  ;;  %v1121_v16 = vrot.slane %v1100_v51, 4  ;;  %886 = vmatpush.bf16.msra.mxu2 %v2741_v54 }
 0x29b   : > { %v1060_v61 = vperm.slane %v1054_v55, %v4339_v9  ;;  %v1077_v20 = vrot.slane %v1072_v13, 4  ;;  %v1119_v17 = vrot.slane %v1106_v2, 4  ;;  %v4594_v19 = vperm.slane %v1068_v59, %v4339_v9 }
 0x29c   : > { %v1383_v21 = vrot.slane %v4534_v11, 4  ;;  %v1083_v63 = vrot.slane %v4589_v7, 4  ;;  %v1110_v24 = vsel %vm919_vm0, %v1095_v60, %v1109_v15  ;;  %v1122_v25 = vsel %vm919_vm0, %v1106_v2, %v1121_v16 }
 0x29d   : > { %v1078_v27 = vsel %vm919_vm0, %v1077_v20, %v1060_v61  ;;  %v1108_v22 = vsel %vm919_vm0, %v1107_v52, %v1089_v46  ;;  %v1120_v30 = vsel %vm919_vm0, %v1119_v17, %v1100_v51  ;;  %v1118_v32 = vperm.slane %v1110_v24, %v4339_v9 }
 0x29e   : > { %v1126_v31 = vperm.slane %v1120_v30, %v4339_v9  ;;  %v1139_v33 = vpack.c.bf16 %v1078_v27, %v1078_v27  ;;  %v1084_v11 = vsel %vm919_vm0, %v4594_v19, %v1083_v63  ;;  %v1130_v35 = vperm.slane %v1122_v25, %v4339_v9  ;;  %887 = vmatpush.bf16.msra.mxu2 %v2740_v38 }
 0x29f   : > { %1697 = vmatpush.bf16.xpose.msrb.mxu3 %v1688_v48  ;;  %v1137_v36 = vrot.slane %v1118_v32, 4  ;;  %v1145_v37 = vpack.c.bf16 %v1084_v11, %v1084_v11  ;;  %v1330_v6 = vsel %vm919_vm0, %v1329_v58, %v4514_v12  ;;  %v1114_v41 = vperm.slane %v1108_v22, %v4339_v9  ;;  %v2738_v48 = vld [vmem:[%s4251_s1 + $0x80] sm:$0xff]  ;;  %s5155_s1 = sld [smem:[#allocation57_spill]] }
 0x2a0   : > { %v1131_v43 = vrot.slane %v1126_v31, 4  ;;  %v1384_v56 = vsel %vm919_vm0, %v1383_v21, %v4520_v26  ;;  %v1391_v29 = vpack.c.bf16 %v1330_v6, %v1330_v6  ;;  %v1645_v12 = vunpack.c.l.b16 %v1139_v33 }
 0x2a1   : > { %v1138_v34 = vsel %vm919_vm0, %v1130_v35, %v1137_v36  ;;  %v1392_v44 = vpack.c.bf16 %v1384_v56, %v1384_v56  ;;  %v1736_v10 = vunpack.c.l.b16 %v1145_v37  ;;  %v1079_v5 = vrot.slane %v1060_v61, 4  ;;  %v2756_v61 = vld [vmem:[#allocation11] sm:$0xff]  }
 0x2a2   : > { %v1132_v45 = vsel %vm919_vm0, %v1131_v43, %v1114_v41  ;;  %v1146_v1 = vpack.c.bf16 %v1138_v34, %v1138_v34  ;;  %v1711_v47 = vunpack.c.l.b16 %v1391_v29  ;;  %888 = vmatpush.bf16.msra.mxu2 %v2739_v50  ;;  %v1133_v18 = vrot.slane %v1114_v41, 4  ;;  %v3090_v41 = vld [vmem:[%s4267_s26 + $0x2] ss:$0 sm:$0xff] }
 0x2a3   : > { %v1140_v8 = vpack.c.bf16 %v1132_v45, %v1132_v45  ;;  %v1712_v49 = vunpack.c.l.b16 %v1392_v44  ;;  %v1080_v55 = vsel %vm919_vm0, %v1072_v13, %v1079_v5  ;;  %v1081_v0 = vrot.slane %v4594_v19, 4 }
 0x2a4   : > { %v1737_v14 = vunpack.c.l.b16 %v1146_v1  ;;  %v1134_v46 = vsel %vm919_vm0, %v1126_v31, %v1133_v18  ;;  %v1141_v60 = vpack.c.bf16 %v1080_v55, %v1080_v55  ;;  %v1135_v58 = vrot.slane %v1130_v35, 4 }
 0x2a5   : > { %v1646_v53 = vunpack.c.l.b16 %v1140_v8  ;;  %v1713_v62 = vpack.c.b16 %v1712_v49, %v1711_v47  ;;  %v1142_v51 = vpack.c.bf16 %v1134_v46, %v1134_v46  ;;  %v1082_v2 = vsel %vm919_vm0, %v1081_v0, %v4589_v7  ;;  %p5158_p10 = scmp.ne.s32.totalorder %s5155_s1, 0 }
 0x2a6   : > { %v1738_v26 = vpack.c.b16 %v1737_v14, %v1736_v10  ;;  %889 = vmatpush.bf16.msra.mxu2 %v2738_v48  ;;  %v1676_v57 = vunpack.c.l.b16 %v1141_v60  ;;  %v1136_v52 = vsel %vm919_vm0, %v1135_v58, %v1118_v32  ;;  %v1143_v3 = vpack.c.bf16 %v1082_v2, %v1082_v2 }
 0x2a7   : > { %v1647_v23 = vpack.c.b16 %v1646_v53, %v1645_v12  ;;  %v1718_v42 = vsel %vm1653_vm1, %v1713_v62, 0  ;;  %v1677_v39 = vunpack.c.l.b16 %v1142_v51  ;;  %v1144_v13 = vpack.c.bf16 %v1136_v52, %v1136_v52 }
 0x2a8   : > { %2673 = vmatmul.msk.bf16.vlgmr.msrb.gmra.mxu0 %vm1653_vm1, %v1738_v26  ;;  %v1706_v15 = vunpack.c.l.b16 %v1143_v3  ;;  %v2757_v20 = vunpack.c.l.bf16 %v2756_v61  ;;  %v2758_v63 = vunpack.c.h.bf16 %v2756_v61 }
 0x2a9   : > { %2670 = vmatmul.msk.bf16.vlgmr.msra.gmra.mxu3 %vm1653_vm1, %v1647_v23  ;;  %890 = vmatmul.bf16.vlgmr.msra.gmra.mxu2 %v2721_v4  ;;  %v1678_v28 = vpack.c.b16 %v1677_v39, %v1676_v57  ;;  %v1707_v59 = vunpack.c.l.b16 %v1144_v13 }
 0x2aa   : > { %1727 = vmatpush.bf16.xpose.msra.mxu3 %v1718_v42 }
 0x2ab   : > { %v1708_v16 = vpack.c.b16 %v1707_v59, %v1706_v15 }
 0x2b9   : > { %2671 = vmatmul.msk.bf16.vlgmr.msrb.gmra.mxu3 %vm1653_vm1, %v1678_v28 }
 0x2c9   : > { %2672 = vmatmul.msk.bf16.vlgmr.msra.gmra.mxu3 %vm1653_vm1, %v1708_v16 }
 0x325   : > { %v1759_v17 = vpop.f32.mrf.mxu0 }
 0x326   : > { %v4632_v19 = vadd.f32 %v2757_v20, %v1759_v17 }
 0x328   : > { %v1783_v54 = vsel %vm1764_vm2, %v4632_v19, -inf }
 0x329   : > { %1784 = vmax.xlane.f32.xlu2 %v1783_v54 }
 0x32c   : > { %v1669_v7 = vpop.f32.mrf.mxu3  ;;  %v891_v36 = vpop.f32.mrf.mxu2 }
 0x32d   : > { %v1670_v21 = vadd.f32 %v2757_v20, %v1669_v7  ;;  %v1761_v25 = vpop.f32.mrf.mxu0  ;;  %v4642_v29 = vadd.f32 %v3090_v41, %v891_v36 }
 0x32e   : > { %v1762_v27 = vadd.f32 %v2758_v63, %v1761_v25 }
 0x32f   : > { %v1765_v24 = vsel %vm1764_vm2, %v1670_v21, -inf }
 0x330   : > { %1766 = vmax.xlane.f32.xlu0 %v1765_v24  ;;  %v1786_v31 = vsel %vm1764_vm2, %v1762_v27, -inf }
 0x334   : > { %v1671_v22 = vpop.f32.mrf.mxu3  ;;  %v893_v43 = vpop.f32.mrf.mxu2 }
 0x335   : > { %v1672_v30 = vadd.f32 %v2758_v63, %v1671_v22  ;;  %v4644_v34 = vadd.f32 %v3090_v41, %v893_v43 }
 0x337   : > { %v1768_v32 = vsel %vm1764_vm2, %v1672_v30, -inf  ;;  %v3068_v1 = vpack.i.bf16 %v4644_v34, %v4642_v29  ;;  %v1473_v22 = vrot.slane %v4644_v34, 4 }
 0x338   : > { %1769 = vmax.xlane.f32.xlu1 %v1768_v32  ;;  %1787 = vmax.xlane.f32.xlu0 %v1786_v31 }
 0x33c   : > { %v1699_v33 = vpop.f32.mrf.mxu3 }
 0x33d   : > { %v1700_v11 = vadd.f32 %v2757_v20, %v1699_v33 }
 0x33f   : > { %v1771_v35 = vsel %vm1764_vm2, %v1700_v11, -inf }
 0x340   : > { %1772 = vmax.xlane.f32.xlu0 %v1771_v35 }
 0x344   : > { %v1701_v37 = vpop.f32.mrf.mxu3 }
 0x345   : > { %v1702_v6 = vadd.f32 %v2758_v63, %v1701_v37 }
 0x347   : > { %v1774_v38 = vsel %vm1764_vm2, %v1702_v6, -inf }
 0x348   : > { %1775 = vmax.xlane.f32.xlu1 %v1774_v38 }
 0x34c   : > { %v1729_v56 = vpop.f32.mrf.mxu3 }
 0x34d   : > { %v1730_v44 = vadd.f32 %v2757_v20, %v1729_v56 }
 0x34f   : > { %v1777_v45 = vsel %vm1764_vm2, %v1730_v44, -inf }
 0x350   : > { %1778 = vmax.xlane.f32.xlu2 %v1777_v45 }
 0x354   : > { %v1731_v10 = vpop.f32.mrf.mxu3  ;;  %3069 = vrot.lane.b32.xlu0 %v3068_v1, %s3603_s14 }
 0x355   : > { %v1732_v47 = vadd.f32 %v2758_v63, %v1731_v10 }
 0x357   : > { %v1780_v8 = vsel %vm1764_vm2, %v1732_v47, -inf }
 0x358   : > { %1781 = vmax.xlane.f32.xlu2 %v1780_v8 }
 0x361   : > { %3059 = vrot.lane.b32.xlu1 %v3068_v1, %s3604_s11 }
 0x370   : > { %3064 = vrot.lane.b32.xlu2 %v3068_v1, %s3605_s3 }
 0x39c   : > { %v1785_v51 = vpop.xlane.xlu2 %1784 }
 0x39d   : > { %v1795_v15 = vsub.f32 %v4632_v19, %v1785_v51 }
 0x39f   : > { %v1809_v61 = vmul.f32 1.442695, %v1795_v15 }
 0x3a3   : > { %v1767_v12 = vpop.xlane.xlu0 %1766 }
 0x3a4   : > { %v1789_v49 = vsub.f32 %v1670_v21, %v1767_v12 }
 0x3a6   : > { %v1797_v50 = vmul.f32 1.442695, %v1789_v49 }
 0x3a8   : > { %3092 = vpow2.f32 %v1797_v50 }
 0x3ab   : > { %v1770_v14 = vpop.xlane.xlu1 %1769  ;;  %v1788_v53 = vpop.xlane.xlu0 %1787 }
 0x3ac   : > { %v1790_v62 = vsub.f32 %v1672_v30, %v1770_v14  ;;  %v1796_v4 = vsub.f32 %v1762_v27, %v1788_v53  ;;  %v1417_v27 = vrot.slane %v4642_v29, 4 }
 0x3ae   : > { %v4653_v26 = vpop.eup %3092  ;;  %v1799_v23 = vmul.f32 1.442695, %v1790_v62  ;;  %v1811_v60 = vmul.f32 1.442695, %v1796_v4 }
 0x3af   : > { %v1813_v5 = vsel %vm1764_vm2, %v4653_v26, 0.0 }
 0x3b0   : > { %3094 = vpow2.f32 %v1799_v23  ;;  %1814 = vadd.xlane.f32.xlu1 %v1813_v5 }
 0x3b3   : > { %v1773_v18 = vpop.xlane.xlu0 %1772 }
 0x3b4   : > { %v1791_v42 = vsub.f32 %v1700_v11, %v1773_v18 }
 0x3b6   : > { %v4657_v48 = vpop.eup %3094  ;;  %v1801_v55 = vmul.f32 1.442695, %v1791_v42 }
 0x3b7   : > { %v1816_v46 = vsel %vm1764_vm2, %v4657_v48, 0.0 }
 0x3b8   : > { %3096 = vpow2.f32 %v1801_v55  ;;  %1817 = vadd.xlane.f32.xlu0 %v1816_v46 }
 0x3b9   : > { %3098 = vpow2.f32 %v1811_v60 }
 0x3bb   : > { %v1776_v28 = vpop.xlane.xlu1 %1775 }
 0x3bc   : > { %v1792_v2 = vsub.f32 %v1702_v6, %v1776_v28 }
 0x3be   : > { %v4661_v57 = vpop.eup %3096  ;;  %v1803_v59 = vmul.f32 1.442695, %v1792_v2 }
 0x3bf   : > { %v1819_v39 = vsel %vm1764_vm2, %v4661_v57, 0.0  ;;  %v4665_v58 = vpop.eup %3098 }
 0x3c0   : > { %1820 = vadd.xlane.f32.xlu0 %v1819_v39  ;;  %v1834_v13 = vsel %vm1764_vm2, %v4665_v58, 0.0 }
 0x3c3   : > { %v1779_v0 = vpop.xlane.xlu2 %1778 }
 0x3c4   : > { %v1793_v52 = vsub.f32 %v1730_v44, %v1779_v0 }
 0x3c6   : > { %v1805_v3 = vmul.f32 1.442695, %v1793_v52  ;;  %v3070_v17 = vpop.permute.xlu0 %3069 }
 0x3c7   : > { %v3071_v63 = vunpack.i.l.bf16 %v3070_v17  ;;  %v3072_v24 = vunpack.i.h.bf16 %v3070_v17 }
 0x3c8   : > { %3100 = vpow2.f32 %v1805_v3  ;;  %1835 = vadd.xlane.f32.xlu0 %v1834_v13 }
 0x3c9   : > { %3102 = vpow2.f32 %v1803_v59  ;;  %v1427_v19 = vrot.slane %v3071_v63, 4  ;;  %v1483_v36 = vrot.slane %v3072_v24, 4 }
 0x3ca   : > { %3104 = vpow2.f32 %v1809_v61 }
 0x3cb   : > { %v1782_v16 = vpop.xlane.xlu2 %1781 }
 0x3cc   : > { %v1794_v20 = vsub.f32 %v1732_v47, %v1782_v16 }
 0x3ce   : > { %v4670_v54 = vpop.eup %3100  ;;  %v1807_v7 = vmul.f32 1.442695, %v1794_v20 }
 0x3cf   : > { %v1825_v21 = vsel %vm1764_vm2, %v4670_v54, 0.0  ;;  %v4674_v25 = vpop.eup %3102 }
 0x3d0   : > { %1826 = vadd.xlane.f32.xlu2 %v1825_v21  ;;  %3106 = vpow2.f32 %v1807_v7  ;;  %v1822_v37 = vsel %vm1764_vm2, %v4674_v25, 0.0  ;;  %v4680_v6 = vpop.eup %3104 }
 0x3d1   : > { %v1831_v23 = vsel %vm1764_vm2, %v4680_v6, 0.0 }
 0x3d3   : > { %v3065_v30 = vpop.permute.xlu2 %3064  ;;  %v3060_v32 = vpop.permute.xlu1 %3059 }
 0x3d4   : > { %v3067_v31 = vunpack.i.h.bf16 %v3065_v30  ;;  %v3066_v33 = vunpack.i.l.bf16 %v3065_v30  ;;  %v3062_v11 = vunpack.i.h.bf16 %v3060_v32  ;;  %v3061_v35 = vunpack.i.l.bf16 %v3060_v32 }
 0x3d6   : > { %v1471_v38 = vrot.slane %v3067_v31, 4  ;;  %v1474_v41 = vsel %vm919_vm0, %v3067_v31, %v1473_v22  ;;  %v1415_v43 = vrot.slane %v3066_v33, 4  ;;  %v1418_v56 = vsel %vm919_vm0, %v3066_v33, %v1417_v27  ;;  %v4692_v50 = vpop.eup %3106 }
 0x3d7   : > { %v1482_v44 = vperm.slane %v1474_v41, %v4309_v40  ;;  %v1426_v45 = vperm.slane %v1418_v56, %v4309_v40  ;;  %v1485_v1 = vrot.slane %v3062_v11, 4  ;;  %v1428_v10 = vsel %vm919_vm0, %v1427_v19, %v3061_v35 }
 0x3d8   : > { %v1472_v47 = vsel %vm919_vm0, %v1471_v38, %v4644_v34  ;;  %v1416_v8 = vsel %vm919_vm0, %v1415_v43, %v4642_v29  ;;  %v1429_v12 = vrot.slane %v3061_v35, 4  ;;  %v1434_v49 = vperm.slane %v1428_v10, %v4309_v40  ;;  %1823 = vadd.xlane.f32.xlu2 %v1822_v37 }
 0x3d9   : > { %v1478_v14 = vperm.slane %v1472_v47, %v4309_v40  ;;  %v1422_v53 = vperm.slane %v1416_v8, %v4309_v40  ;;  %v1453_v62 = vrot.slane %v1426_v45, 4  ;;  %v1484_v18 = vsel %vm919_vm0, %v1483_v36, %v3062_v11 }
 0x3da   : > { %v1430_v5 = vsel %vm919_vm0, %v3071_v63, %v1429_v12  ;;  %v1439_v34 = vrot.slane %v1434_v49, 4  ;;  %v1486_v29 = vsel %vm919_vm0, %v3072_v24, %v1485_v1  ;;  %v1490_v46 = vperm.slane %v1484_v18, %v4309_v40 }
 0x3db   : > { %v1497_v42 = vrot.slane %v1478_v14, 4  ;;  %v1441_v4 = vrot.slane %v1422_v53, 4  ;;  %v1438_v55 = vperm.slane %v1430_v5, %v4309_v40  ;;  %v1509_v60 = vrot.slane %v1482_v44, 4 }
 0x3dc   : > { %v1440_v51 = vsel %vm919_vm0, %v1439_v34, %v1422_v53  ;;  %v1494_v39 = vperm.slane %v1486_v29, %v4309_v40  ;;  %v1828_v28 = vsel %vm1764_vm2, %v4692_v50, 0.0  ;;  %v1495_v59 = vrot.slane %v1490_v46, 4 }
 0x3dd   : > { %v1442_v0 = vsel %vm919_vm0, %v1434_v49, %v1441_v4  ;;  %v1446_v2 = vperm.slane %v1440_v51, %v4339_v9  ;;  %v1451_v52 = vrot.slane %v1438_v55, 4  ;;  %v1454_v3 = vsel %vm919_vm0, %v1438_v55, %v1453_v62  ;;  %1829 = vadd.xlane.f32.xlu1 %v1828_v28 }
 0x3de   : > { %v1450_v13 = vperm.slane %v1442_v0, %v4339_v9  ;;  %v1462_v15 = vperm.slane %v1454_v3, %v4339_v9  ;;  %v1498_v16 = vsel %vm919_vm0, %v1490_v46, %v1497_v42  ;;  %v1507_v7 = vrot.slane %v1494_v39, 4 }
 0x3df   : > { %v1452_v61 = vsel %vm919_vm0, %v1451_v52, %v1426_v45  ;;  %v1463_v20 = vrot.slane %v1446_v2, 4  ;;  %v1506_v17 = vperm.slane %v1498_v16, %v4339_v9  ;;  %v1496_v19 = vsel %vm919_vm0, %v1495_v59, %v1478_v14 }
 0x3e0   : > { %v1458_v21 = vperm.slane %v1452_v61, %v4339_v9  ;;  %v1465_v63 = vrot.slane %v1450_v13, 4  ;;  %v1469_v24 = vrot.slane %v1462_v15, 4  ;;  %v1502_v22 = vperm.slane %v1496_v19, %v4339_v9 }
 0x3e1   : > { %v1464_v27 = vsel %vm919_vm0, 0.0, %v1463_v20  ;;  %v1508_v30 = vsel %vm919_vm0, %v1507_v7, %v1482_v44  ;;  %v1510_v32 = vsel %vm919_vm0, %v1494_v39, %v1509_v60  ;;  %v1521_v38 = vrot.slane %v1506_v17, 4 }
 0x3e2   : > { %v1466_v31 = vsel %vm919_vm0, 0.0, %v1465_v63  ;;  %v1467_v33 = vrot.slane %v1458_v21, 4  ;;  %v1470_v11 = vsel %vm919_vm0, 0.0, %v1469_v24  ;;  %v1514_v35 = vperm.slane %v1508_v30, %v4339_v9 }
 0x3e3   : > { %v1518_v36 = vperm.slane %v1510_v32, %v4339_v9  ;;  %v1519_v37 = vrot.slane %v1502_v22, 4  ;;  %v1527_v41 = vsel %vm919_vm0, %v1465_v63, %v1446_v2  ;;  %v1532_v45 = vrot.slane %v1466_v31, 4 }
 0x3e4   : > { %v1468_v43 = vsel %vm919_vm0, 0.0, %v1467_v33  ;;  %v1523_v56 = vrot.slane %v1514_v35, 4  ;;  %v1531_v44 = vperm.slane %v1527_v41, %v4309_v40  ;;  %v1522_v10 = vsel %vm919_vm0, 0.0, %v1521_v38 }
 0x3e5   : > { %v1520_v1 = vsel %vm919_vm0, 0.0, %v1519_v37  ;;  %v1525_v47 = vrot.slane %v1518_v36, 4  ;;  %v1538_v8 = vsel %vm919_vm0, %v1469_v24, %v1458_v21  ;;  %1832 = vadd.xlane.f32.xlu1 %v1831_v23  ;;  %v1533_v49 = vsel %vm919_vm0, %v1532_v45, %v1464_v27 }
 0x3e6   : > { %v1524_v12 = vsel %vm919_vm0, 0.0, %v1523_v56  ;;  %v1542_v14 = vperm.slane %v1538_v8, %v4309_v40  ;;  %v1543_v53 = vrot.slane %v1470_v11, 4  ;;  %v1581_v5 = vsel %vm919_vm0, %v1521_v38, %v1502_v22 }
 0x3e7   : > { %v1526_v62 = vsel %vm919_vm0, 0.0, %v1525_v47  ;;  %v1586_v34 = vrot.slane %v1522_v10, 4  ;;  %v1592_v18 = vsel %vm919_vm0, %v1525_v47, %v1514_v35  ;;  %v1585_v42 = vperm.slane %v1581_v5, %v4309_v40 }
 0x3e8   : > { %v1544_v29 = vsel %vm919_vm0, %v1543_v53, %v1468_v43  ;;  %v1596_v23 = vperm.slane %v1592_v18, %v4309_v40  ;;  %v1597_v4 = vrot.slane %v1526_v62, 4  ;;  %v1537_v46 = vperm.slane %v1533_v49, %v4309_v40 }
 0x3e9   : > { %v1587_v55 = vsel %vm919_vm0, %v1586_v34, %v1520_v1  ;;  %v1548_v60 = vperm.slane %v1544_v29, %v4309_v40  ;;  %v1551_v51 = vrot.slane %v1531_v44, 4  ;;  %v1563_v28 = vrot.slane %v1542_v14, 4 }
 0x3ea   : > { %v1598_v39 = vsel %vm919_vm0, %v1597_v4, %v1524_v12  ;;  %v1591_v0 = vperm.slane %v1587_v55, %v4309_v40  ;;  %v1605_v2 = vrot.slane %v1585_v42, 4  ;;  %v1617_v13 = vrot.slane %v1596_v23, 4 }
 0x3eb   : > { %v1552_v52 = vsel %vm919_vm0, %v1537_v46, %v1551_v51  ;;  %v1602_v3 = vperm.slane %v1598_v39, %v4309_v40  ;;  %v1549_v15 = vrot.slane %v1537_v46, 4  ;;  %v1564_v16 = vsel %vm919_vm0, %v1548_v60, %v1563_v28 }
 0x3ec   : > { %v1560_v59 = vperm.slane %v1552_v52, %v4339_v9  ;;  %v1606_v61 = vsel %vm919_vm0, %v1591_v0, %v1605_v2  ;;  %v1561_v20 = vrot.slane %v1548_v60, 4  ;;  %v1572_v17 = vperm.slane %v1564_v16, %v4339_v9 }
 0x3ed   : > { %v1614_v7 = vperm.slane %v1606_v61, %v4339_v9  ;;  %v1618_v21 = vsel %vm919_vm0, %v1602_v3, %v1617_v13  ;;  %v1550_v63 = vsel %vm919_vm0, %v1549_v15, %v1531_v44  ;;  %v1603_v22 = vrot.slane %v1591_v0, 4 }
 0x3ee   : > { %v1626_v24 = vperm.slane %v1618_v21, %v4339_v9  ;;  %v1556_v19 = vperm.slane %v1550_v63, %v4339_v9  ;;  %v1562_v27 = vsel %vm919_vm0, %v1561_v20, %v1542_v14  ;;  %v1577_v30 = vrot.slane %v1572_v17, 4 }
 0x3ef   : > { %v1568_v32 = vperm.slane %v1562_v27, %v4339_v9  ;;  %v1615_v31 = vrot.slane %v1602_v3, 4  ;;  %v1579_v33 = vrot.slane %v1560_v59, 4  ;;  %v1604_v36 = vsel %vm919_vm0, %v1603_v22, %v1585_v42 }
 0x3f0   : > { %v1631_v11 = vrot.slane %v1626_v24, 4  ;;  %v1575_v35 = vrot.slane %v1556_v19, 4  ;;  %v1633_v37 = vrot.slane %v1614_v7, 4  ;;  %v1578_v38 = vsel %vm919_vm0, %v1577_v30, %v1560_v59 }
 0x3f1   : > { %v1573_v41 = vrot.slane %v1568_v32, 4  ;;  %v1610_v43 = vperm.slane %v1604_v36, %v4339_v9  ;;  %v1616_v56 = vsel %vm919_vm0, %v1615_v31, %v1596_v23  ;;  %v1639_v45 = vpack.c.bf16 %v1578_v38, %v1578_v38 }
 0x3f2   : > { %v1632_v44 = vsel %vm919_vm0, %v1631_v11, %v1614_v7  ;;  %v1622_v1 = vperm.slane %v1616_v56, %v4339_v9  ;;  %v1580_v10 = vsel %vm919_vm0, %v1572_v17, %v1579_v33  ;;  %v1634_v49 = vsel %vm919_vm0, %v1626_v24, %v1633_v37 }
 0x3f3   : > { %v1640_v47 = vpack.c.bf16 %v1632_v44, %v1632_v44  ;;  %v1574_v8 = vsel %vm919_vm0, %v1573_v41, %v1556_v19  ;;  %v1629_v12 = vrot.slane %v1610_v43, 4  ;;  %v1924_v14 = vunpack.c.l.b16 %v1639_v45 }
 0x3f4   : > { %v1627_v53 = vrot.slane %v1622_v1, 4  ;;  %v1635_v62 = vpack.c.bf16 %v1574_v8, %v1574_v8  ;;  %v1641_v5 = vpack.c.bf16 %v1580_v10, %v1580_v10  ;;  %v1642_v18 = vpack.c.bf16 %v1634_v49, %v1634_v49 }
 0x3f5   : > { %v1925_v34 = vunpack.c.l.b16 %v1640_v47  ;;  %v1576_v29 = vsel %vm919_vm0, %v1568_v32, %v1575_v35  ;;  %v1630_v42 = vsel %vm919_vm0, %v1622_v1, %v1629_v12 }
 0x3f6   : > { %v1628_v23 = vsel %vm919_vm0, %v1627_v53, %v1610_v43  ;;  %v1868_v4 = vunpack.c.l.b16 %v1635_v62  ;;  %v1952_v55 = vunpack.c.l.b16 %v1641_v5  ;;  %v1637_v46 = vpack.c.bf16 %v1576_v29, %v1576_v29 }
 0x3f7   : > { %v1926_v60 = vpack.c.b16 %v1925_v34, %v1924_v14  ;;  %v1636_v51 = vpack.c.bf16 %v1628_v23, %v1628_v23  ;;  %v1953_v39 = vunpack.c.l.b16 %v1642_v18  ;;  %v1638_v28 = vpack.c.bf16 %v1630_v42, %v1630_v42 }
 0x3f8   : > { %v1896_v0 = vunpack.c.l.b16 %v1637_v46 }
 0x3f9   : > { %1938 = vmatpush.bf16.msrb.mxu3 %v1926_v60  ;;  %v1869_v2 = vunpack.c.l.b16 %v1636_v51  ;;  %v1954_v52 = vpack.c.b16 %v1953_v39, %v1952_v55  ;;  %v1897_v3 = vunpack.c.l.b16 %v1638_v28 }
 0x3fb   : > { %v1870_v13 = vpack.c.b16 %v1869_v2, %v1868_v4  ;;  %1966 = vmatpush.bf16.msra.mxu0 %v1954_v52  ;;  %v1898_v15 = vpack.c.b16 %v1897_v3, %v1896_v0 }
 0x3fd   : > { %1882 = vmatpush.bf16.msrb.mxu2 %v1870_v13 }
 0x401   : > { %1910 = vmatpush.bf16.msra.mxu2 %v1898_v15 }
 0x423   : > { %v1815_v59 = vpop.xlane.xlu1 %1814 }
 0x424   : > { %3108 = vrcp.f32 %v1815_v59 }
 0x42a   : > { %v3109_v61 = vpop.eup %3108 }
 0x42b   : > { %v1818_v16 = vpop.xlane.xlu0 %1817  ;;  %v1845_v20 = vmul.f32 %v3109_v61, %v4653_v26 }
 0x42c   : > { %3110 = vrcp.f32 %v1818_v16 }
 0x42d   : > { %v1853_v7 = vpack.c.bf16 %v1845_v20, %v1845_v20 }
 0x42f   : > { %v1863_v24 = vunpack.c.l.b16 %v1853_v7 }
 0x432   : > { %v3111_v17 = vpop.eup %3110 }
 0x433   : > { %v1846_v21 = vmul.f32 %v3111_v17, %v4657_v48  ;;  %v1821_v22 = vpop.xlane.xlu0 %1820 }
 0x434   : > { %3112 = vrcp.f32 %v1821_v22 }
 0x435   : > { %v1854_v63 = vpack.c.bf16 %v1846_v21, %v1846_v21 }
 0x437   : > { %v1864_v19 = vunpack.c.l.b16 %v1854_v63 }
 0x439   : > { %v1865_v27 = vpack.c.b16 %v1864_v19, %v1863_v24 }
 0x43a   : > { %v3113_v31 = vpop.eup %3112 }
 0x43b   : > { %2674 = vmatmul.msk.bf16.vlgmr.msrb.gmra.mxu2 %vm1764_vm2, %v1865_v27  ;;  %v1847_v33 = vmul.f32 %v3113_v31, %v4661_v57  ;;  %v1836_v26 = vpop.xlane.xlu0 %1835  ;;  %v2753_v31 = vld [vmem:[%s4260_s16 + $0x38] sm:$0xff] }
 0x43c   : > { %2277 = vmatpush.bf16.msrb.mxu1 %v2753_v31 }
 0x43d   : > { %v1855_v36 = vpack.c.bf16 %v1847_v33, %v1847_v33 }
 0x43f   : > { %v1891_v56 = vunpack.c.l.b16 %v1855_v36 }
 0x443   : > { %v1827_v30 = vpop.xlane.xlu2 %1826 }
 0x444   : > { %3114 = vrcp.f32 %v1827_v30 }
 0x44a   : > { %v3115_v35 = vpop.eup %3114 }
 0x44b   : > { %v1824_v32 = vpop.xlane.xlu2 %1823  ;;  %v1849_v38 = vmul.f32 %v3115_v35, %v4670_v54 }
 0x44c   : > { %3116 = vrcp.f32 %v1824_v32 }
 0x44d   : > { %v1857_v45 = vpack.c.bf16 %v1849_v38, %v1849_v38 }
 0x44f   : > { %v1919_v49 = vunpack.c.l.b16 %v1857_v45 }
 0x450   : > { %v1830_v11 = vpop.xlane.xlu1 %1829 }
 0x451   : > { %3118 = vrcp.f32 %v1830_v11 }
 0x452   : > { %v3117_v48 = vpop.eup %3116  ;;  %3120 = vrcp.f32 %v1836_v26 }
 0x453   : > { %v1848_v37 = vmul.f32 %v3117_v48, %v4674_v25 }
 0x455   : > { %v1856_v41 = vpack.c.bf16 %v1848_v37, %v1848_v37 }
 0x457   : > { %v3119_v43 = vpop.eup %3118  ;;  %v1892_v44 = vunpack.c.l.b16 %v1856_v41 }
 0x458   : > { %v1850_v1 = vmul.f32 %v3119_v43, %v4692_v50  ;;  %v1833_v10 = vpop.xlane.xlu1 %1832  ;;  %v3121_v57 = vpop.eup %3120 }
 0x459   : > { %v1893_v47 = vpack.c.b16 %v1892_v44, %v1891_v56  ;;  %3122 = vrcp.f32 %v1833_v10  ;;  %v1852_v12 = vmul.f32 %v3121_v57, %v4665_v58 }
 0x45a   : > { %v1858_v8 = vpack.c.bf16 %v1850_v1, %v1850_v1 }
 0x45b   : > { %2675 = vmatmul.msk.bf16.vlgmr.msra.gmra.mxu2 %vm1764_vm2, %v1893_v47  ;;  %v1860_v53 = vpack.c.bf16 %v1852_v12, %v1852_v12 }
 0x45c   : > { %v1920_v25 = vunpack.c.l.b16 %v1858_v8 }
 0x45d   : > { %v1948_v50 = vunpack.c.l.b16 %v1860_v53 }
 0x45e   : > { %v1921_v14 = vpack.c.b16 %v1920_v25, %v1919_v49 }
 0x45f   : > { %v3123_v54 = vpop.eup %3122 }
 0x460   : > { %v1851_v62 = vmul.f32 %v3123_v54, %v4680_v6  ;;  %2676 = vmatmul.msk.bf16.vlgmr.msrb.gmra.mxu3 %vm1764_vm2, %v1921_v14 }
 0x462   : > { %v1859_v5 = vpack.c.bf16 %v1851_v62, %v1851_v62 }
 0x464   : > { %v1947_v34 = vunpack.c.l.b16 %v1859_v5 }
 0x466   : > { %v1949_v18 = vpack.c.b16 %v1948_v50, %v1947_v34 }
 0x468   : > { %2677 = vmatmul.msk.bf16.vlgmr.msra.gmra.mxu0 %vm1764_vm2, %v1949_v18 }
 0x4be   : > { %v1884_v29 = vpop.f32.mrf.mxu2 }
 0x4bf   : > { %v1975_v4 = vrot.slane %v1884_v29, 4 }
 0x4c6   : > { %v1886_v42 = vpop.f32.mrf.mxu2 }
 0x4c7   : > { %v2031_v7 = vrot.slane %v1886_v42, 4 }
 0x4de   : > { %v1912_v23 = vpop.f32.mrf.mxu2 }
 0x4df   : > { %v1987_v58 = vrot.slane %v1912_v23, 4 }
 0x4e3   : > { %v1940_v55 = vpop.f32.mrf.mxu3 }
 0x4e4   : > { %v1973_v46 = vrot.slane %v1940_v55, 4  ;;  %v1976_v60 = vsel %vm919_vm0, %v1940_v55, %v1975_v4 }
 0x4e5   : > { %v1984_v51 = vperm.slane %v1976_v60, %v4309_v40  ;;  %v1968_v6 = vpop.f32.mrf.mxu0 }
 0x4e6   : > { %v1974_v39 = vsel %vm919_vm0, %v1973_v46, %v1884_v29  ;;  %v1985_v28 = vrot.slane %v1968_v6, 4  ;;  %v1988_v0 = vsel %vm919_vm0, %v1968_v6, %v1987_v58  ;;  %v1914_v17 = vpop.f32.mrf.mxu2 }
 0x4e7   : > { %v1980_v2 = vperm.slane %v1974_v39, %v4309_v40  ;;  %v2011_v52 = vrot.slane %v1984_v51, 4  ;;  %v1996_v3 = vperm.slane %v1988_v0, %v4309_v40  ;;  %v2043_v26 = vrot.slane %v1914_v17, 4 }
 0x4e8   : > { %v1986_v13 = vsel %vm919_vm0, %v1985_v28, %v1912_v23 }
 0x4e9   : > { %v1999_v15 = vrot.slane %v1980_v2, 4  ;;  %v1992_v59 = vperm.slane %v1986_v13, %v4309_v40  ;;  %v2009_v16 = vrot.slane %v1996_v3, 4  ;;  %v2012_v61 = vsel %vm919_vm0, %v1996_v3, %v2011_v52 }
 0x4ea   : > { %v2020_v20 = vperm.slane %v2012_v61, %v4339_v9 }
 0x4eb   : > { %v1997_v21 = vrot.slane %v1992_v59, 4  ;;  %v2000_v63 = vsel %vm919_vm0, %v1992_v59, %v1999_v15  ;;  %v2010_v24 = vsel %vm919_vm0, %v2009_v16, %v1984_v51  ;;  %v1942_v19 = vpop.f32.mrf.mxu3 }
 0x4ec   : > { %v2008_v27 = vperm.slane %v2000_v63, %v4339_v9  ;;  %v2016_v22 = vperm.slane %v2010_v24, %v4339_v9  ;;  %v2027_v30 = vrot.slane %v2020_v20, 4  ;;  %v2029_v32 = vrot.slane %v1942_v19, 4 }
 0x4ed   : > { %v1998_v33 = vsel %vm919_vm0, %v1997_v21, %v1980_v2  ;;  %v2032_v11 = vsel %vm919_vm0, %v1942_v19, %v2031_v7  ;;  %v1970_v44 = vpop.f32.mrf.mxu0 }
 0x4ee   : > { %v2004_v35 = vperm.slane %v1998_v33, %v4339_v9  ;;  %v2023_v48 = vrot.slane %v2008_v27, 4  ;;  %v2025_v36 = vrot.slane %v2016_v22, 4  ;;  %v2028_v37 = vsel %vm919_vm0, 0.0, %v2027_v30 }
 0x4ef   : > { %v2096_v38 = vsel %vm919_vm0, %v2027_v30, %v2016_v22  ;;  %v2101_v41 = vrot.slane %v2028_v37, 4  ;;  %v2030_v43 = vsel %vm919_vm0, %v2029_v32, %v1886_v42  ;;  %v2040_v56 = vperm.slane %v2032_v11, %v4309_v40 }
 0x4f0   : > { %v2021_v45 = vrot.slane %v2004_v35, 4  ;;  %v2024_v1 = vsel %vm919_vm0, 0.0, %v2023_v48  ;;  %v2026_v10 = vsel %vm919_vm0, 0.0, %v2025_v36  ;;  %v2085_v57 = vsel %vm919_vm0, %v2023_v48, %v2004_v35 }
 0x4f1   : > { %v2090_v47 = vrot.slane %v2024_v1, 4  ;;  %v2100_v8 = vperm.slane %v2096_v38, %v4309_v40  ;;  %v2102_v12 = vsel %vm919_vm0, %v2101_v41, %v2026_v10  ;;  %v2036_v49 = vperm.slane %v2030_v43, %v4309_v40 }
 0x4f2   : > { %v2106_v25 = vperm.slane %v2102_v12, %v4309_v40  ;;  %v2067_v14 = vrot.slane %v2040_v56, 4  ;;  %v2041_v54 = vrot.slane %v1970_v44, 4  ;;  %v2044_v53 = vsel %vm919_vm0, %v1970_v44, %v2043_v26 }
 0x4f3   : > { %v2121_v62 = vrot.slane %v2100_v8, 4  ;;  %v2055_v5 = vrot.slane %v2036_v49, 4  ;;  %v2052_v50 = vperm.slane %v2044_v53, %v4309_v40  ;;  %v2022_v34 = vsel %vm919_vm0, 0.0, %v2021_v45 }
 0x4f4   : > { %v2042_v18 = vsel %vm919_vm0, %v2041_v54, %v1914_v17  ;;  %v2089_v29 = vperm.slane %v2085_v57, %v4309_v40  ;;  %v2091_v42 = vsel %vm919_vm0, %v2090_v47, %v2022_v34  ;;  %v2119_v23 = vrot.slane %v2106_v25, 4 }
 0x4f5   : > { %v2048_v4 = vperm.slane %v2042_v18, %v4309_v40  ;;  %v2065_v58 = vrot.slane %v2052_v50, 4  ;;  %v2068_v55 = vsel %vm919_vm0, %v2052_v50, %v2067_v14  ;;  %v2095_v46 = vperm.slane %v2091_v42, %v4309_v40 }
 0x4f6   : > { %v2076_v60 = vperm.slane %v2068_v55, %v4339_v9  ;;  %v2109_v28 = vrot.slane %v2089_v29, 4  ;;  %v2122_v3 = vsel %vm919_vm0, %v2106_v25, %v2121_v62  ;;  %v2120_v59 = vsel %vm919_vm0, %v2119_v23, %v2100_v8 }
 0x4f7   : > { %v2053_v51 = vrot.slane %v2048_v4, 4  ;;  %v2056_v6 = vsel %vm919_vm0, %v2048_v4, %v2055_v5  ;;  %v2066_v39 = vsel %vm919_vm0, %v2065_v58, %v2040_v56  ;;  %v2107_v15 = vrot.slane %v2095_v46, 4 }
 0x4f8   : > { %v2064_v0 = vperm.slane %v2056_v6, %v4339_v9  ;;  %v2072_v2 = vperm.slane %v2066_v39, %v4339_v9  ;;  %v2083_v52 = vrot.slane %v2076_v60, 4  ;;  %v2110_v63 = vsel %vm919_vm0, %v2095_v46, %v2109_v28  ;;  %v2752_v39 = vld [vmem:[%s4260_s16 + $0x30] sm:$0xff]  ;;  %v2751_v28 = vld [vmem:[%s4260_s16 + $0x28] sm:$0xff] }
 0x4f9   : > { %v2054_v13 = vsel %vm919_vm0, %v2053_v51, %v2036_v49  ;;  %v2130_v24 = vperm.slane %v2122_v3, %v4339_v9  ;;  %v2108_v48 = vsel %vm919_vm0, %v2107_v15, %v2089_v29  ;;  %v2118_v37 = vperm.slane %v2110_v63, %v4339_v9  ;;  %2278 = vmatpush.bf16.msrb.mxu1 %v2752_v39  ;;  %v2747_v3 = vld [vmem:[%s4260_s16 + $0x8] sm:$0xff] }
 0x4fa   : > { %v2060_v16 = vperm.slane %v2054_v13, %v4339_v9  ;;  %v2079_v61 = vrot.slane %v2064_v0, 4  ;;  %v2081_v20 = vrot.slane %v2072_v2, 4  ;;  %v2084_v17 = vsel %vm919_vm0, 0.0, %v2083_v52  ;;  %v2750_v0 = vld [vmem:[%s4260_s16 + $0x20] sm:$0xff] }
 0x4fb   : > { %v2150_v7 = vsel %vm919_vm0, %v2083_v52, %v2072_v2  ;;  %v2155_v21 = vrot.slane %v2084_v17, 4  ;;  %v2114_v56 = vperm.slane %v2108_v48, %v4339_v9  ;;  %v2126_v44 = vperm.slane %v2120_v59, %v4339_v9  ;;  %v2749_v2 = vld [vmem:[%s4260_s16 + $0x18] sm:$0xff]  ;;  %v2748_v52 = vld [vmem:[%s4260_s16 + $0x10] sm:$0xff]  ;;  %v2746_v13 = vld [vmem:[%s4260_s16] sm:$0xff]  ;;  %s5156_s16 = sld [smem:[#allocation73_spill]] }
 0x4fc   : > { %v2077_v19 = vrot.slane %v2060_v16, 4  ;;  %v2080_v27 = vsel %vm919_vm0, 0.0, %v2079_v61  ;;  %v2082_v22 = vsel %vm919_vm0, 0.0, %v2081_v20  ;;  %v2139_v30 = vsel %vm919_vm0, %v2079_v61, %v2060_v16 }
 0x4fd   : > { %v2144_v32 = vrot.slane %v2080_v27, 4  ;;  %v2154_v31 = vperm.slane %v2150_v7, %v4309_v40  ;;  %v2156_v33 = vsel %vm919_vm0, %v2155_v21, %v2082_v22  ;;  %v2143_v26 = vperm.slane %v2139_v30, %v4309_v40  ;;  %2279 = vmatpush.bf16.msrb.mxu1 %v2751_v28 }
 0x4fe   : > { %v2078_v11 = vsel %vm919_vm0, 0.0, %v2077_v19  ;;  %v2160_v35 = vperm.slane %v2156_v33, %v4309_v40  ;;  %v2135_v1 = vrot.slane %v2130_v24, 4  ;;  %v2131_v8 = vrot.slane %v2126_v44, 4  ;;  %v3091_v33 = vld [vmem:[%s598_s30] ss:$0 sm:$0xff] }
 0x4ff   : > { %v2175_v36 = vrot.slane %v2154_v31, 4  ;;  %v2145_v38 = vsel %vm919_vm0, %v2144_v32, %v2078_v11  ;;  %v2163_v41 = vrot.slane %v2143_v26, 4  ;;  %v2137_v25 = vrot.slane %v2118_v37, 4 }
 0x500   : > { %v2149_v43 = vperm.slane %v2145_v38, %v4309_v40  ;;  %v2173_v45 = vrot.slane %v2160_v35, 4  ;;  %v2132_v62 = vsel %vm919_vm0, %v2131_v8, %v2114_v56  ;;  %v2133_v50 = vrot.slane %v2114_v56, 4 }
 0x501   : > { %v2176_v10 = vsel %vm919_vm0, %v2160_v35, %v2175_v36  ;;  %v2136_v18 = vsel %vm919_vm0, %v2135_v1, %v2118_v37  ;;  %v2138_v4 = vsel %vm919_vm0, %v2130_v24, %v2137_v25  ;;  %2280 = vmatpush.bf16.msrb.mxu1 %v2750_v0  ;;  %s2305_s22 = scalar_lea.hbm %s5156_s16, %s2754_s28 }
 0x502   : > { %v2164_v57 = vsel %vm919_vm0, %v2149_v43, %v2163_v41  ;;  %v2184_v47 = vperm.slane %v2176_v10, %v4339_v9  ;;  %v2161_v12 = vrot.slane %v2149_v43, 4  ;;  %v2174_v40 = vsel %vm919_vm0, %v2173_v45, %v2154_v31  ;;  %s2308_s25 = sshll.u32 %s2305_s22, 4  ;;  %s2309_s25 = int_to_ptr.hbm [resolvable:$true] %s2308_s25 }
 0x503   : > { %v2172_v49 = vperm.slane %v2164_v57, %v4339_v9  ;;  %v2180_v53 = vperm.slane %v2174_v40, %v4339_v9  ;;  %s3372_s26 = sshra.s32 %s2309_s25, 4  ;;  %s3373_s26 = int_to_ptr.hbm [resolvable:$true] %s3372_s26 }
 0x504   : > { %v2189_v14 = vrot.slane %v2184_v47, 4  ;;  %v2162_v54 = vsel %vm919_vm0, %v2161_v12, %v2143_v26 }
 0x505   : > { %v2191_v5 = vrot.slane %v2172_v49, 4  ;;  %v2168_v34 = vperm.slane %v2162_v54, %v4339_v9  ;;  %v2185_v42 = vrot.slane %v2180_v53, 4  ;;  %v2134_v9 = vsel %vm919_vm0, %v2126_v44, %v2133_v50  ;;  %2281 = vmatpush.bf16.msrb.mxu1 %v2749_v2 }
 0x506   : > { %v2190_v29 = vsel %vm919_vm0, %v2189_v14, %v2172_v49 }
 0x507   : > { %v3078_v23 = vpack.i.bf16 %v2190_v29, %v2136_v18  ;;  %v2192_v58 = vsel %vm919_vm0, %v2184_v47, %v2191_v5  ;;  %v2187_v55 = vrot.slane %v2168_v34, 4  ;;  %v2186_v60 = vsel %vm919_vm0, %v2185_v42, %v2168_v34 }
 0x508   : > { %v3083_v46 = vpack.i.bf16 %v2192_v58, %v2138_v4 }
 0x509   : > { %3079 = vrot.lane.b32.xlu1 %v3078_v23, %s3605_s3  ;;  %v2188_v51 = vsel %vm919_vm0, %v2180_v53, %v2187_v55  ;;  %2282 = vmatpush.bf16.msrb.mxu1 %v2748_v52  ;;  %s5157_s3 = smov %s5156_s16 }
 0x50a   : > { %3084 = vrot.lane.b32.xlu0 %v3083_v46, %s3604_s11  ;;  %v3073_v6 = vpack.i.bf16 %v2188_v51, %v2134_v9  ;;  %s3378_s13 = scalar_lea.hbm %s5157_s3, 64  ;;  %p3379_p11 = scmp.lt.s32.totalorder %s3373_s26, %s5157_s3 }
 0x50c   : > { %3074 = vrot.lane.b32.xlu2 %v3073_v6, %s3603_s14  ;;  %s3374_s14 = scalar_lea.hbm %s3373_s26, 16 }
 0x50d   : > { %2283 = vmatpush.bf16.msrb.mxu1 %v2747_v3  ;;  %p3375_p6 = scmp.ne.s32.totalorder %s3373_s26, %s3374_s14  ;;  %p3380_p4 = scmp.lt.s32.totalorder %s3378_s13, %s3374_s14 }
 0x50f   : > { %p3376_p2 = pnand %p3375_p6, %p5158_p10  ;;  %p3381_p9 = por %p3380_p4, %p3379_p11 }
 0x511   : > { %2284 = vmatpush.bf16.msrb.mxu1 %v2746_v13  ;;  %p3377_p3 = pneg %p3376_p2 }
 0x513   : > { %p3382_p7 = pnand %p3381_p9, %p3377_p3 }
 0x566   : > { %v3075_v15 = vpop.permute.xlu2 %3074 }
 0x567   : > { %v3077_v59 = vunpack.i.h.bf16 %v3075_v15  ;;  %v3076_v16 = vunpack.i.l.bf16 %v3075_v15 }
 0x569   : > { %v2217_v21 = vsel %vm1653_vm1, %v2132_v62, %v3076_v16  ;;  %v2218_v63 = vsel %vm1653_vm1, %v2186_v60, %v3077_v59 }
 0x57b   : > { %v3080_v61 = vpop.permute.xlu1 %3079 }
 0x57c   : > { %v3082_v20 = vunpack.i.h.bf16 %v3080_v61  ;;  %v3081_v17 = vunpack.i.l.bf16 %v3080_v61  ;;  %v3085_v7 = vpop.permute.xlu0 %3084 }
 0x57d   : > { %v3087_v24 = vunpack.i.h.bf16 %v3085_v7  ;;  %v3086_v19 = vunpack.i.l.bf16 %v3085_v7 }
 0x57e   : > { %v2220_v27 = vsel %vm2219_vm3, %v2217_v21, %v3081_v17  ;;  %v2221_v22 = vsel %vm2219_vm3, %v2218_v63, %v3082_v20 }
 0x57f   : > { %v2223_v30 = vsel %vm2222_vm4, %v2220_v27, %v3086_v19  ;;  %v2224_v32 = vsel %vm2222_vm4, %v2221_v22, %v3087_v24 }
 0x580   : > { %v2225_v31 = vpack.c.bf16 %v2224_v32, %v2223_v30 }
 0x582   : > { %2285 = vmatmul.bf16.vlgmr.msrb.gmra.mxu1 %v2225_v31 }
 0x5ff   : > { %v2286_v26 = vpop.f32.mrf.mxu1 }
 0x600   : > { %v2287_v11 = vadd.f32 %v3091_v33, %v2286_v26 }
 0x602   : > { %2291 = vst [vmem:[%s588_s2] sm:$0xff] %v2287_v11 }
 0x607   : > { %v2288_v35 = vpop.f32.mrf.mxu1 }
 0x608   : > { %v2289_v48 = vadd.f32 %v3091_v33, %v2288_v35 }
 0x60a   : > { %2292 = vst [vmem:[%s588_s2 + $0x8] sm:$0xff] %v2289_v48 }
 0x60b   : > { %3385 = shalt.err (!%p3382_p7)
}
 0x60c   : > { %s3608_s30 = smov 128   ;;  %s3609_s19 = smov 8  }
 0x60d   : > { %2793 = dma.vmem_to_hbm [thread:$0]  (%p5158_p10), %s2307_s27, 256, %s2309_s25, %s2294_s18, %s3608_s30, %s3608_s30, %s3609_s19  }
 0x60e PF: > { %s5159_s8 = sld [smem:[#allocation38_spill]]  ;;  %p2837_p5 = scmp.ge.s32.totalorder %s3594_s20, 2 }
 0x60f   : > { %s5160_s0 = sld [smem:[#allocation58_spill]] }
 0x614   : > { %s2323_s17 = sand.u32 1, %s5159_s8  }
 0x615   : > { %p5161_p12 = scmp.ne.s32.totalorder %s5160_s0, 0  ;;  %s2324_s9 = scalar_lea.sflag [#allocation7], %s2323_s17 }
 0x617   : > { %p2831_p8 = pnand %p2837_p5, %p5161_p12 }
 0x619   : > { %p2832_p1 = pneg %p2831_p8 }
 0x61b   : > { %3505 = dma.done.wait (%p2832_p1), %s2324_s9, 256  }
 0x61c   : > { %3507 = vsyncadd (%p2832_p1), %s2324_s9, 4294967040  ;;  %s5162_s20 = sld [smem:[#allocation53_spill]]  ;;  %s5182_s28 = smov %s3550_s29 }
 0x61d   : > { %s5163_s0 = sld [smem:[#allocation39_spill]]  ;;  %s5184_s14 = smov %s3574_s15 }
 0x61e   : > { %s5164_s21 = sld [smem:[#allocation40_spill]] }
 0x61f   : > { %s5165_s1 = sld [smem:[#allocation55_spill]] }
 0x620   : > { %s5166_s22 = sld [smem:[#allocation42_spill]] }
 0x621   : > { %s5167_s23 = sld [smem:[#allocation43_spill]] }
 0x622   : > { %s5168_s25 = sld [smem:[#allocation45_spill]]  ;;  %p40_p13 = scmp.ge.s32.totalorder %s5162_s20, 6  }
 0x623   : > { %s5169_s26 = sld [smem:[#allocation46_spill]] }
 0x624   : > { %s5170_s27 = sld [smem:[#allocation64_spill]] }
 0x625   : > { %s5171_s2 = sld [smem:[#allocation47_spill]] }
 0x626   : > { %s5172_s30 = sld [smem:[#allocation63_spill]] }
 0x627   : > { %s5173_s11 = sld [smem:[#allocation48_spill]] }
 0x628   : > { %s5174_s12 = sld [smem:[#allocation49_spill]] }
 0x629   : > { %s5175_s13 = sld [smem:[#allocation62_spill]] }
 0x62a   : > { %s5176_s4 = sld [smem:[#allocation50_spill]] }
 0x62b   : > { %s5177_s16 = sld [smem:[#allocation60_spill]]  ;;  %s5183_s29 = smov %s5171_s2 }
 0x62c   : > { %s5178_s17 = sld [smem:[#allocation51_spill]]  ;;  %42 = sbr.rel (!%p40_p13) target bundleno = 32 (0x20), region = 165 }
 0x62d   : > { %s5179_s18 = sld [smem:[#allocation52_spill]] }
 0x62e   : > { %s5180_s19 = sld [smem:[#allocation56_spill]] }
 0x630   : > { %s5185_s15 = smov %s5176_s4 }
 0x631   :  { %2330 = vsyncpa [#allocation6], 1 }
 0x632   :  { %2332 = vsyncpa [#allocation6 + $0x1], 1 }
 0x633   :  { %2333 = vsyncpa [#allocation9], 1 }
 0x634   :  { %2335 = vsyncpa [#allocation9 + $0x1], 1 }
 0x635   :  { %2336 = vsyncpa [#allocation12], 1 }
 0x636   :  { %2337 = vsyncpa [#allocation7], 1 }
 0x637   :  { %2339 = vsyncpa [#allocation7 + $0x1], 1 }

</bundles_post_ra>
